<compile_context>
chip_gen: v6e
topology: v6e:2x2x1
jax: 0.10.0
libtpu: 0.0.40
codegen_flags: <defaults>
</compile_context>

<pallas_src>
import math
from functools import partial

import jax
import jax.numpy as jnp
from jax.experimental import pallas as pl
from jax.experimental.pallas import tpu as pltpu


# ----------------------------- forward: gather ------------------------------

def _embed_gather_kernel(ids_ref, table_hbm, o_ref, rows_vmem, sems,
                         *, scale, tb):
    """Double-buffered embedding-row gather.

    rows_vmem: (2*tb, D) VMEM scratch, two tb-row slots.
    sems:      (2*tb,)   DMA semaphores, one per row slot.
    Step i waits on slot (i & 1) (filled last step / primed at i==0) and
    prefetches block i+1 into the other slot before waiting.
    """
    i = pl.program_id(0)
    n_blocks = pl.num_programs(0)
    slot = i & 1

    def issue(block_idx, slot_idx):
        base = block_idx * tb
        off = slot_idx * tb
        # All token-id SMEM reads happen before any DMA wait.
        for t in range(tb):
            tok = ids_ref[base + t]                       # scalar read (SMEM)
            pltpu.make_async_copy(
                table_hbm.at[pl.ds(tok, 1), :],           # (1, D) row in HBM
                rows_vmem.at[pl.ds(off + t, 1), :],       # (1, D) VMEM slot
                sems.at[off + t],
            ).start()

    # Prime the pipeline: the very first step issues its own block.
    @pl.when(i == 0)
    def _():
        issue(0, 0)

    # Prefetch the next block into the other slot before waiting on this one,
    # hiding its HBM latency behind this step's waits + store.
    @pl.when(i + 1 < n_blocks)
    def _():
        issue(i + 1, 1 - slot)

    # Wait for the current block's row DMAs.
    cur_off = slot * tb
    for t in range(tb):
        pltpu.make_async_copy(
            table_hbm.at[pl.ds(0, 1), :],                 # size-only for wait
            rows_vmem.at[pl.ds(cur_off + t, 1), :],
            sems.at[cur_off + t],
        ).wait()

    # Single lane-dense (tb, D) store in the table dtype, scale fused in.
    start = pl.multiple_of(slot * tb, tb)
    rows = rows_vmem[pl.ds(start, tb), :]
    o_ref[...] = (rows * jnp.asarray(scale, dtype=rows.dtype)).astype(o_ref.dtype)


def embeddings_forward(ids, table, *, max_row_block=256):
    """ids: int array of any shape; table: (vocab, d_model).

    Returns table.dtype array of shape [*ids.shape, d_model].
    """
    V, D = table.shape
    scale = math.sqrt(D)

    orig_shape = ids.shape
    flat = ids.reshape(-1).astype(jnp.int32)
    n = flat.shape[0]

    # Rows gathered per grid step: big enough to amortize per-step overhead,
    # rounded to the sublane packing of the table dtype.
    itemsize = jnp.dtype(table.dtype).itemsize
    sub = {4: 8, 2: 16, 1: 32}.get(itemsize, 8)
    tb = min(max_row_block, ((n + sub - 1) // sub) * sub)
    tb = max(tb, sub)
    n_pad = ((n + tb - 1) // tb) * tb
    if n_pad != n:
        # TODO(synk): padded tokens gather row 0 (wasted DMAs, sliced off below).
        flat = jnp.concatenate([flat, jnp.zeros((n_pad - n,), jnp.int32)])

    kernel = partial(_embed_gather_kernel, scale=scale, tb=tb)
    out = pl.pallas_call(
        kernel,
        out_shape=jax.ShapeDtypeStruct((n_pad, D), table.dtype),
        grid_spec=pltpu.PrefetchScalarGridSpec(
            num_scalar_prefetch=1,                         # token ids -> SMEM
            grid=(n_pad // tb,),
            in_specs=[pl.BlockSpec(memory_space=pl.ANY)],  # table stays in HBM
            out_specs=pl.BlockSpec((tb, D), lambda i, ids: (i, 0)),
            scratch_shapes=[
                pltpu.VMEM((2 * tb, D), table.dtype),      # double buffer
                pltpu.SemaphoreType.DMA((2 * tb,)),
            ],
        ),
        # Cross-step DMA carry (block i fetched during step i-1) makes this
        # axis sequential -> "arbitrary", not "parallel".
        compiler_params=pltpu.CompilerParams(
            dimension_semantics=("arbitrary",)),
    )(flat, table)

    return out[:n].reshape(*orig_shape, D)


# ------------------------ forward_prob: K-tiled GEMM -------------------------

def _embed_prob_kernel(xp_ref, tab_ref, o_ref, acc_ref, *, scale):
    k = pl.program_id(1)

    @pl.when(k == 0)
    def _():
        acc_ref[...] = jnp.zeros_like(acc_ref)

    acc_ref[...] += jnp.dot(xp_ref[...], tab_ref[...],
                            preferred_element_type=jnp.float32)

    @pl.when(k == pl.num_programs(1) - 1)
    def _():
        o_ref[...] = (acc_ref[...] * scale).astype(o_ref.dtype)


def embeddings_forward_prob(x_prob, table, *, row_tile=256, k_tile=512):
    """x_prob: (..., vocab) soft token distribution. Returns (..., d_model)."""
    V, D = table.shape
    scale = math.sqrt(D)

    orig = x_prob.shape
    flat = x_prob.reshape(-1, V)
    n = flat.shape[0]
    out_dtype = jnp.result_type(flat.dtype, table.dtype)

    # Row (M) tile.
    tm = min(row_tile, ((n + 7) // 8) * 8)
    tm = max(tm, 8)
    n_pad = ((n + tm - 1) // tm) * tm

    # Vocab (K, contraction) tile: multiple of 128 so both the (tm, tk) LHS
    # block and the (tk, D) RHS block are layout-aligned; caps VMEM use at
    # realistic vocab sizes instead of keeping the whole table resident.
    tk = min(k_tile, ((V + 127) // 128) * 128)
    v_pad = ((V + tk - 1) // tk) * tk

    if n_pad != n or v_pad != V:
        flat = jnp.pad(flat, ((0, n_pad - n), (0, v_pad - V)))
    tab = jnp.pad(table, ((0, v_pad - V), (0, 0))) if v_pad != V else table

    out = pl.pallas_call(
        partial(_embed_prob_kernel, scale=scale),
        out_shape=jax.ShapeDtypeStruct((n_pad, D), out_dtype),
        grid=(n_pad // tm, v_pad // tk),
        in_specs=[pl.BlockSpec((tm, tk), lambda i, k: (i, k)),
                  pl.BlockSpec((tk, D), lambda i, k: (k, 0))],   # revisited RHS
        out_specs=pl.BlockSpec((tm, D), lambda i, k: (i, 0)),
        scratch_shapes=[pltpu.VMEM((tm, D), jnp.float32)],
        compiler_params=pltpu.CompilerParams(
            dimension_semantics=("parallel", "arbitrary")),
    )(flat, tab)

    return out[:n].reshape(*orig[:-1], D)


# ---------------------------------- main -------------------------------------

if __name__ == "__main__":
    B, T, VOCAB, D_MODEL = 2, 8, 512, 128   # D_MODEL = 128 keeps stores lane-dense

    key = jax.random.PRNGKey(0)
    k_ids, k_tab = jax.random.split(key)
    ids = jax.random.randint(k_ids, (B, T), 0, VOCAB, dtype=jnp.int32)
    table = jax.random.normal(k_tab, (VOCAB, D_MODEL), jnp.float32)  # lut.weight

    # forward(x)
    out = jax.block_until_ready(embeddings_forward(ids, table))
    ref = jnp.take(table, ids.reshape(-1), axis=0).reshape(B, T, D_MODEL) \
        * math.sqrt(D_MODEL)
    assert out.shape == (B, T, D_MODEL)
    assert bool(jnp.all(jnp.isfinite(out)))
    assert bool(jnp.allclose(out, ref, atol=1e-5, rtol=1e-5))

    # forward_prob(x_prob): check with one-hot probabilities (must match forward)
    x_prob = jax.nn.one_hot(ids, VOCAB, dtype=jnp.float32)
    out_p = jax.block_until_ready(embeddings_forward_prob(x_prob, table))
    assert out_p.shape == (B, T, D_MODEL)
    assert bool(jnp.allclose(out_p, ref, atol=1e-4, rtol=1e-5))

    # TODO(synk): training-time paths (embedding grad / parameter init) are out
    # of scope; forward-only (eval) semantics implemented.
    print("KERNEL_OK")
</pallas_src>

<mosaic_0001>
module attributes {stable_mosaic.version = 11 : i64} {
  func.func @_embed_gather_kernel(%arg0: i32, %arg1: memref<16xi32, #tpu.memory_space<smem>>, %arg2: memref<512x128xf32, #tpu.memory_space<any>>, %arg3: memref<16x128xf32, #tpu.memory_space<vmem>>, %arg4: memref<32x128xf32, #tpu.memory_space<vmem>>, %arg5: memref<32x!tpu.dma_semaphore, #tpu.memory_space<semaphore_mem>>) attributes {dimension_semantics = [#tpu.dimension_semantics<arbitrary>], iteration_bounds = array<i64: 1>, scalar_prefetch = 1 : i64, scratch_operands = 2 : i64, tpu.core_type = #tpu.core_type<tc>, window_params = [{}, {transform_indices = @transform_1, window_bounds = array<i64: 16, 128>}]} {
    %c1_i32 = arith.constant 1 : i32
    %0 = arith.andi %arg0, %c1_i32 : i32
    %c0_i32 = arith.constant 0 : i32
    %1 = arith.cmpi eq, %arg0, %c0_i32 : i32
    %2 = arith.extui %1 : i1 to i32
    %c0_i32_0 = arith.constant 0 : i32
    %3 = arith.cmpi ne, %2, %c0_i32_0 : i32
    scf.if %3 {
      %c0_73 = arith.constant 0 : index
      %112 = memref.load %arg1[%c0_73] : memref<16xi32, #tpu.memory_space<smem>>
      %c0_i32_74 = arith.constant 0 : i32
      %c0_i32_75 = arith.constant 0 : i32
      %113 = tpu.memref_slice %arg2[%112, %c0_i32_75] : memref<512x128xf32, #tpu.memory_space<any>> -> memref<1x128xf32, #tpu.memory_space<any>>
      %c0_i32_76 = arith.constant 0 : i32
      %c0_i32_77 = arith.constant 0 : i32
      %114 = tpu.memref_slice %arg4[%c0_i32_76, %c0_i32_77] : memref<32x128xf32, #tpu.memory_space<vmem>> -> memref<1x128xf32, #tpu.memory_space<vmem>>
      %115 = tpu.memref_slice %arg5[%c0_i32_74] : memref<32x!tpu.dma_semaphore, #tpu.memory_space<semaphore_mem>> -> memref<1x!tpu.dma_semaphore, #tpu.memory_space<semaphore_mem>>
      %116 = tpu.memref_squeeze %115 : memref<1x!tpu.dma_semaphore, #tpu.memory_space<semaphore_mem>> -> memref<!tpu.dma_semaphore, #tpu.memory_space<semaphore_mem>>
      tpu.enqueue_dma source(%113 : memref<1x128xf32, #tpu.memory_space<any>>) target(%114 : memref<1x128xf32, #tpu.memory_space<vmem>>) target_semaphore(%116 : memref<!tpu.dma_semaphore, #tpu.memory_space<semaphore_mem>>)
      %c1 = arith.constant 1 : index
      %117 = memref.load %arg1[%c1] : memref<16xi32, #tpu.memory_space<smem>>
      %c1_i32_78 = arith.constant 1 : i32
      %c0_i32_79 = arith.constant 0 : i32
      %118 = tpu.memref_slice %arg2[%117, %c0_i32_79] : memref<512x128xf32, #tpu.memory_space<any>> -> memref<1x128xf32, #tpu.memory_space<any>>
      %c1_i32_80 = arith.constant 1 : i32
      %c0_i32_81 = arith.constant 0 : i32
      %119 = tpu.memref_slice %arg4[%c1_i32_80, %c0_i32_81] : memref<32x128xf32, #tpu.memory_space<vmem>> -> memref<1x128xf32, #tpu.memory_space<vmem>>
      %120 = tpu.memref_slice %arg5[%c1_i32_78] : memref<32x!tpu.dma_semaphore, #tpu.memory_space<semaphore_mem>> -> memref<1x!tpu.dma_semaphore, #tpu.memory_space<semaphore_mem>>
      %121 = tpu.memref_squeeze %120 : memref<1x!tpu.dma_semaphore, #tpu.memory_space<semaphore_mem>> -> memref<!tpu.dma_semaphore, #tpu.memory_space<semaphore_mem>>
      tpu.enqueue_dma source(%118 : memref<1x128xf32, #tpu.memory_space<any>>) target(%119 : memref<1x128xf32, #tpu.memory_space<vmem>>) target_semaphore(%121 : memref<!tpu.dma_semaphore, #tpu.memory_space<semaphore_mem>>)
      %c2 = arith.constant 2 : index
      %122 = memref.load %arg1[%c2] : memref<16xi32, #tpu.memory_space<smem>>
      %c2_i32_82 = arith.constant 2 : i32
      %c0_i32_83 = arith.constant 0 : i32
      %123 = tpu.memref_slice %arg2[%122, %c0_i32_83] : memref<512x128xf32, #tpu.memory_space<any>> -> memref<1x128xf32, #tpu.memory_space<any>>
      %c2_i32_84 = arith.constant 2 : i32
      %c0_i32_85 = arith.constant 0 : i32
      %124 = tpu.memref_slice %arg4[%c2_i32_84, %c0_i32_85] : memref<32x128xf32, #tpu.memory_space<vmem>> -> memref<1x128xf32, #tpu.memory_space<vmem>>
      %125 = tpu.memref_slice %arg5[%c2_i32_82] : memref<32x!tpu.dma_semaphore, #tpu.memory_space<semaphore_mem>> -> memref<1x!tpu.dma_semaphore, #tpu.memory_space<semaphore_mem>>
      %126 = tpu.memref_squeeze %125 : memref<1x!tpu.dma_semaphore, #tpu.memory_space<semaphore_mem>> -> memref<!tpu.dma_semaphore, #tpu.memory_space<semaphore_mem>>
      tpu.enqueue_dma source(%123 : memref<1x128xf32, #tpu.memory_space<any>>) target(%124 : memref<1x128xf32, #tpu.memory_space<vmem>>) target_semaphore(%126 : memref<!tpu.dma_semaphore, #tpu.memory_space<semaphore_mem>>)
      %c3 = arith.constant 3 : index
      %127 = memref.load %arg1[%c3] : memref<16xi32, #tpu.memory_space<smem>>
      %c3_i32_86 = arith.constant 3 : i32
      %c0_i32_87 = arith.constant 0 : i32
      %128 = tpu.memref_slice %arg2[%127, %c0_i32_87] : memref<512x128xf32, #tpu.memory_space<any>> -> memref<1x128xf32, #tpu.memory_space<any>>
      %c3_i32_88 = arith.constant 3 : i32
      %c0_i32_89 = arith.constant 0 : i32
      %129 = tpu.memref_slice %arg4[%c3_i32_88, %c0_i32_89] : memref<32x128xf32, #tpu.memory_space<vmem>> -> memref<1x128xf32, #tpu.memory_space<vmem>>
      %130 = tpu.memref_slice %arg5[%c3_i32_86] : memref<32x!tpu.dma_semaphore, #tpu.memory_space<semaphore_mem>> -> memref<1x!tpu.dma_semaphore, #tpu.memory_space<semaphore_mem>>
      %131 = tpu.memref_squeeze %130 : memref<1x!tpu.dma_semaphore, #tpu.memory_space<semaphore_mem>> -> memref<!tpu.dma_semaphore, #tpu.memory_space<semaphore_mem>>
      tpu.enqueue_dma source(%128 : memref<1x128xf32, #tpu.memory_space<any>>) target(%129 : memref<1x128xf32, #tpu.memory_space<vmem>>) target_semaphore(%131 : memref<!tpu.dma_semaphore, #tpu.memory_space<semaphore_mem>>)
      %c4 = arith.constant 4 : index
      %132 = memref.load %arg1[%c4] : memref<16xi32, #tpu.memory_space<smem>>
      %c4_i32_90 = arith.constant 4 : i32
      %c0_i32_91 = arith.constant 0 : i32
      %133 = tpu.memref_slice %arg2[%132, %c0_i32_91] : memref<512x128xf32, #tpu.memory_space<any>> -> memref<1x128xf32, #tpu.memory_space<any>>
      %c4_i32_92 = arith.constant 4 : i32
      %c0_i32_93 = arith.constant 0 : i32
      %134 = tpu.memref_slice %arg4[%c4_i32_92, %c0_i32_93] : memref<32x128xf32, #tpu.memory_space<vmem>> -> memref<1x128xf32, #tpu.memory_space<vmem>>
      %135 = tpu.memref_slice %arg5[%c4_i32_90] : memref<32x!tpu.dma_semaphore, #tpu.memory_space<semaphore_mem>> -> memref<1x!tpu.dma_semaphore, #tpu.memory_space<semaphore_mem>>
      %136 = tpu.memref_squeeze %135 : memref<1x!tpu.dma_semaphore, #tpu.memory_space<semaphore_mem>> -> memref<!tpu.dma_semaphore, #tpu.memory_space<semaphore_mem>>
      tpu.enqueue_dma source(%133 : memref<1x128xf32, #tpu.memory_space<any>>) target(%134 : memref<1x128xf32, #tpu.memory_space<vmem>>) target_semaphore(%136 : memref<!tpu.dma_semaphore, #tpu.memory_space<semaphore_mem>>)
      %c5 = arith.constant 5 : index
      %137 = memref.load %arg1[%c5] : memref<16xi32, #tpu.memory_space<smem>>
      %c5_i32_94 = arith.constant 5 : i32
      %c0_i32_95 = arith.constant 0 : i32
      %138 = tpu.memref_slice %arg2[%137, %c0_i32_95] : memref<512x128xf32, #tpu.memory_space<any>> -> memref<1x128xf32, #tpu.memory_space<any>>
      %c5_i32_96 = arith.constant 5 : i32
      %c0_i32_97 = arith.constant 0 : i32
      %139 = tpu.memref_slice %arg4[%c5_i32_96, %c0_i32_97] : memref<32x128xf32, #tpu.memory_space<vmem>> -> memref<1x128xf32, #tpu.memory_space<vmem>>
      %140 = tpu.memref_slice %arg5[%c5_i32_94] : memref<32x!tpu.dma_semaphore, #tpu.memory_space<semaphore_mem>> -> memref<1x!tpu.dma_semaphore, #tpu.memory_space<semaphore_mem>>
      %141 = tpu.memref_squeeze %140 : memref<1x!tpu.dma_semaphore, #tpu.memory_space<semaphore_mem>> -> memref<!tpu.dma_semaphore, #tpu.memory_space<semaphore_mem>>
      tpu.enqueue_dma source(%138 : memref<1x128xf32, #tpu.memory_space<any>>) target(%139 : memref<1x128xf32, #tpu.memory_space<vmem>>) target_semaphore(%141 : memref<!tpu.dma_semaphore, #tpu.memory_space<semaphore_mem>>)
      %c6 = arith.constant 6 : index
      %142 = memref.load %arg1[%c6] : memref<16xi32, #tpu.memory_space<smem>>
      %c6_i32_98 = arith.constant 6 : i32
      %c0_i32_99 = arith.constant 0 : i32
      %143 = tpu.memref_slice %arg2[%142, %c0_i32_99] : memref<512x128xf32, #tpu.memory_space<any>> -> memref<1x128xf32, #tpu.memory_space<any>>
      %c6_i32_100 = arith.constant 6 : i32
      %c0_i32_101 = arith.constant 0 : i32
      %144 = tpu.memref_slice %arg4[%c6_i32_100, %c0_i32_101] : memref<32x128xf32, #tpu.memory_space<vmem>> -> memref<1x128xf32, #tpu.memory_space<vmem>>
      %145 = tpu.memref_slice %arg5[%c6_i32_98] : memref<32x!tpu.dma_semaphore, #tpu.memory_space<semaphore_mem>> -> memref<1x!tpu.dma_semaphore, #tpu.memory_space<semaphore_mem>>
      %146 = tpu.memref_squeeze %145 : memref<1x!tpu.dma_semaphore, #tpu.memory_space<semaphore_mem>> -> memref<!tpu.dma_semaphore, #tpu.memory_space<semaphore_mem>>
      tpu.enqueue_dma source(%143 : memref<1x128xf32, #tpu.memory_space<any>>) target(%144 : memref<1x128xf32, #tpu.memory_space<vmem>>) target_semaphore(%146 : memref<!tpu.dma_semaphore, #tpu.memory_space<semaphore_mem>>)
      %c7 = arith.constant 7 : index
      %147 = memref.load %arg1[%c7] : memref<16xi32, #tpu.memory_space<smem>>
      %c7_i32_102 = arith.constant 7 : i32
      %c0_i32_103 = arith.constant 0 : i32
      %148 = tpu.memref_slice %arg2[%147, %c0_i32_103] : memref<512x128xf32, #tpu.memory_space<any>> -> memref<1x128xf32, #tpu.memory_space<any>>
      %c7_i32_104 = arith.constant 7 : i32
      %c0_i32_105 = arith.constant 0 : i32
      %149 = tpu.memref_slice %arg4[%c7_i32_104, %c0_i32_105] : memref<32x128xf32, #tpu.memory_space<vmem>> -> memref<1x128xf32, #tpu.memory_space<vmem>>
      %150 = tpu.memref_slice %arg5[%c7_i32_102] : memref<32x!tpu.dma_semaphore, #tpu.memory_space<semaphore_mem>> -> memref<1x!tpu.dma_semaphore, #tpu.memory_space<semaphore_mem>>
      %151 = tpu.memref_squeeze %150 : memref<1x!tpu.dma_semaphore, #tpu.memory_space<semaphore_mem>> -> memref<!tpu.dma_semaphore, #tpu.memory_space<semaphore_mem>>
      tpu.enqueue_dma source(%148 : memref<1x128xf32, #tpu.memory_space<any>>) target(%149 : memref<1x128xf32, #tpu.memory_space<vmem>>) target_semaphore(%151 : memref<!tpu.dma_semaphore, #tpu.memory_space<semaphore_mem>>)
      %c8 = arith.constant 8 : index
      %152 = memref.load %arg1[%c8] : memref<16xi32, #tpu.memory_space<smem>>
      %c8_i32_106 = arith.constant 8 : i32
      %c0_i32_107 = arith.constant 0 : i32
      %153 = tpu.memref_slice %arg2[%152, %c0_i32_107] : memref<512x128xf32, #tpu.memory_space<any>> -> memref<1x128xf32, #tpu.memory_space<any>>
      %c8_i32_108 = arith.constant 8 : i32
      %c0_i32_109 = arith.constant 0 : i32
      %154 = tpu.memref_slice %arg4[%c8_i32_108, %c0_i32_109] : memref<32x128xf32, #tpu.memory_space<vmem>> -> memref<1x128xf32, #tpu.memory_space<vmem>>
      %155 = tpu.memref_slice %arg5[%c8_i32_106] : memref<32x!tpu.dma_semaphore, #tpu.memory_space<semaphore_mem>> -> memref<1x!tpu.dma_semaphore, #tpu.memory_space<semaphore_mem>>
      %156 = tpu.memref_squeeze %155 : memref<1x!tpu.dma_semaphore, #tpu.memory_space<semaphore_mem>> -> memref<!tpu.dma_semaphore, #tpu.memory_space<semaphore_mem>>
      tpu.enqueue_dma source(%153 : memref<1x128xf32, #tpu.memory_space<any>>) target(%154 : memref<1x128xf32, #tpu.memory_space<vmem>>) target_semaphore(%156 : memref<!tpu.dma_semaphore, #tpu.memory_space<semaphore_mem>>)
      %c9 = arith.constant 9 : index
      %157 = memref.load %arg1[%c9] : memref<16xi32, #tpu.memory_space<smem>>
      %c9_i32_110 = arith.constant 9 : i32
      %c0_i32_111 = arith.constant 0 : i32
      %158 = tpu.memref_slice %arg2[%157, %c0_i32_111] : memref<512x128xf32, #tpu.memory_space<any>> -> memref<1x128xf32, #tpu.memory_space<any>>
      %c9_i32_112 = arith.constant 9 : i32
      %c0_i32_113 = arith.constant 0 : i32
      %159 = tpu.memref_slice %arg4[%c9_i32_112, %c0_i32_113] : memref<32x128xf32, #tpu.memory_space<vmem>> -> memref<1x128xf32, #tpu.memory_space<vmem>>
      %160 = tpu.memref_slice %arg5[%c9_i32_110] : memref<32x!tpu.dma_semaphore, #tpu.memory_space<semaphore_mem>> -> memref<1x!tpu.dma_semaphore, #tpu.memory_space<semaphore_mem>>
      %161 = tpu.memref_squeeze %160 : memref<1x!tpu.dma_semaphore, #tpu.memory_space<semaphore_mem>> -> memref<!tpu.dma_semaphore, #tpu.memory_space<semaphore_mem>>
      tpu.enqueue_dma source(%158 : memref<1x128xf32, #tpu.memory_space<any>>) target(%159 : memref<1x128xf32, #tpu.memory_space<vmem>>) target_semaphore(%161 : memref<!tpu.dma_semaphore, #tpu.memory_space<semaphore_mem>>)
      %c10 = arith.constant 10 : index
      %162 = memref.load %arg1[%c10] : memref<16xi32, #tpu.memory_space<smem>>
      %c10_i32_114 = arith.constant 10 : i32
      %c0_i32_115 = arith.constant 0 : i32
      %163 = tpu.memref_slice %arg2[%162, %c0_i32_115] : memref<512x128xf32, #tpu.memory_space<any>> -> memref<1x128xf32, #tpu.memory_space<any>>
      %c10_i32_116 = arith.constant 10 : i32
      %c0_i32_117 = arith.constant 0 : i32
      %164 = tpu.memref_slice %arg4[%c10_i32_116, %c0_i32_117] : memref<32x128xf32, #tpu.memory_space<vmem>> -> memref<1x128xf32, #tpu.memory_space<vmem>>
      %165 = tpu.memref_slice %arg5[%c10_i32_114] : memref<32x!tpu.dma_semaphore, #tpu.memory_space<semaphore_mem>> -> memref<1x!tpu.dma_semaphore, #tpu.memory_space<semaphore_mem>>
      %166 = tpu.memref_squeeze %165 : memref<1x!tpu.dma_semaphore, #tpu.memory_space<semaphore_mem>> -> memref<!tpu.dma_semaphore, #tpu.memory_space<semaphore_mem>>
      tpu.enqueue_dma source(%163 : memref<1x128xf32, #tpu.memory_space<any>>) target(%164 : memref<1x128xf32, #tpu.memory_space<vmem>>) target_semaphore(%166 : memref<!tpu.dma_semaphore, #tpu.memory_space<semaphore_mem>>)
      %c11 = arith.constant 11 : index
      %167 = memref.load %arg1[%c11] : memref<16xi32, #tpu.memory_space<smem>>
      %c11_i32_118 = arith.constant 11 : i32
      %c0_i32_119 = arith.constant 0 : i32
      %168 = tpu.memref_slice %arg2[%167, %c0_i32_119] : memref<512x128xf32, #tpu.memory_space<any>> -> memref<1x128xf32, #tpu.memory_space<any>>
      %c11_i32_120 = arith.constant 11 : i32
      %c0_i32_121 = arith.constant 0 : i32
      %169 = tpu.memref_slice %arg4[%c11_i32_120, %c0_i32_121] : memref<32x128xf32, #tpu.memory_space<vmem>> -> memref<1x128xf32, #tpu.memory_space<vmem>>
      %170 = tpu.memref_slice %arg5[%c11_i32_118] : memref<32x!tpu.dma_semaphore, #tpu.memory_space<semaphore_mem>> -> memref<1x!tpu.dma_semaphore, #tpu.memory_space<semaphore_mem>>
      %171 = tpu.memref_squeeze %170 : memref<1x!tpu.dma_semaphore, #tpu.memory_space<semaphore_mem>> -> memref<!tpu.dma_semaphore, #tpu.memory_space<semaphore_mem>>
      tpu.enqueue_dma source(%168 : memref<1x128xf32, #tpu.memory_space<any>>) target(%169 : memref<1x128xf32, #tpu.memory_space<vmem>>) target_semaphore(%171 : memref<!tpu.dma_semaphore, #tpu.memory_space<semaphore_mem>>)
      %c12 = arith.constant 12 : index
      %172 = memref.load %arg1[%c12] : memref<16xi32, #tpu.memory_space<smem>>
      %c12_i32_122 = arith.constant 12 : i32
      %c0_i32_123 = arith.constant 0 : i32
      %173 = tpu.memref_slice %arg2[%172, %c0_i32_123] : memref<512x128xf32, #tpu.memory_space<any>> -> memref<1x128xf32, #tpu.memory_space<any>>
      %c12_i32_124 = arith.constant 12 : i32
      %c0_i32_125 = arith.constant 0 : i32
      %174 = tpu.memref_slice %arg4[%c12_i32_124, %c0_i32_125] : memref<32x128xf32, #tpu.memory_space<vmem>> -> memref<1x128xf32, #tpu.memory_space<vmem>>
      %175 = tpu.memref_slice %arg5[%c12_i32_122] : memref<32x!tpu.dma_semaphore, #tpu.memory_space<semaphore_mem>> -> memref<1x!tpu.dma_semaphore, #tpu.memory_space<semaphore_mem>>
      %176 = tpu.memref_squeeze %175 : memref<1x!tpu.dma_semaphore, #tpu.memory_space<semaphore_mem>> -> memref<!tpu.dma_semaphore, #tpu.memory_space<semaphore_mem>>
      tpu.enqueue_dma source(%173 : memref<1x128xf32, #tpu.memory_space<any>>) target(%174 : memref<1x128xf32, #tpu.memory_space<vmem>>) target_semaphore(%176 : memref<!tpu.dma_semaphore, #tpu.memory_space<semaphore_mem>>)
      %c13 = arith.constant 13 : index
      %177 = memref.load %arg1[%c13] : memref<16xi32, #tpu.memory_space<smem>>
      %c13_i32_126 = arith.constant 13 : i32
      %c0_i32_127 = arith.constant 0 : i32
      %178 = tpu.memref_slice %arg2[%177, %c0_i32_127] : memref<512x128xf32, #tpu.memory_space<any>> -> memref<1x128xf32, #tpu.memory_space<any>>
      %c13_i32_128 = arith.constant 13 : i32
      %c0_i32_129 = arith.constant 0 : i32
      %179 = tpu.memref_slice %arg4[%c13_i32_128, %c0_i32_129] : memref<32x128xf32, #tpu.memory_space<vmem>> -> memref<1x128xf32, #tpu.memory_space<vmem>>
      %180 = tpu.memref_slice %arg5[%c13_i32_126] : memref<32x!tpu.dma_semaphore, #tpu.memory_space<semaphore_mem>> -> memref<1x!tpu.dma_semaphore, #tpu.memory_space<semaphore_mem>>
      %181 = tpu.memref_squeeze %180 : memref<1x!tpu.dma_semaphore, #tpu.memory_space<semaphore_mem>> -> memref<!tpu.dma_semaphore, #tpu.memory_space<semaphore_mem>>
      tpu.enqueue_dma source(%178 : memref<1x128xf32, #tpu.memory_space<any>>) target(%179 : memref<1x128xf32, #tpu.memory_space<vmem>>) target_semaphore(%181 : memref<!tpu.dma_semaphore, #tpu.memory_space<semaphore_mem>>)
      %c14 = arith.constant 14 : index
      %182 = memref.load %arg1[%c14] : memref<16xi32, #tpu.memory_space<smem>>
      %c14_i32_130 = arith.constant 14 : i32
      %c0_i32_131 = arith.constant 0 : i32
      %183 = tpu.memref_slice %arg2[%182, %c0_i32_131] : memref<512x128xf32, #tpu.memory_space<any>> -> memref<1x128xf32, #tpu.memory_space<any>>
      %c14_i32_132 = arith.constant 14 : i32
      %c0_i32_133 = arith.constant 0 : i32
      %184 = tpu.memref_slice %arg4[%c14_i32_132, %c0_i32_133] : memref<32x128xf32, #tpu.memory_space<vmem>> -> memref<1x128xf32, #tpu.memory_space<vmem>>
      %185 = tpu.memref_slice %arg5[%c14_i32_130] : memref<32x!tpu.dma_semaphore, #tpu.memory_space<semaphore_mem>> -> memref<1x!tpu.dma_semaphore, #tpu.memory_space<semaphore_mem>>
      %186 = tpu.memref_squeeze %185 : memref<1x!tpu.dma_semaphore, #tpu.memory_space<semaphore_mem>> -> memref<!tpu.dma_semaphore, #tpu.memory_space<semaphore_mem>>
      tpu.enqueue_dma source(%183 : memref<1x128xf32, #tpu.memory_space<any>>) target(%184 : memref<1x128xf32, #tpu.memory_space<vmem>>) target_semaphore(%186 : memref<!tpu.dma_semaphore, #tpu.memory_space<semaphore_mem>>)
      %c15 = arith.constant 15 : index
      %187 = memref.load %arg1[%c15] : memref<16xi32, #tpu.memory_space<smem>>
      %c15_i32_134 = arith.constant 15 : i32
      %c0_i32_135 = arith.constant 0 : i32
      %188 = tpu.memref_slice %arg2[%187, %c0_i32_135] : memref<512x128xf32, #tpu.memory_space<any>> -> memref<1x128xf32, #tpu.memory_space<any>>
      %c15_i32_136 = arith.constant 15 : i32
      %c0_i32_137 = arith.constant 0 : i32
      %189 = tpu.memref_slice %arg4[%c15_i32_136, %c0_i32_137] : memref<32x128xf32, #tpu.memory_space<vmem>> -> memref<1x128xf32, #tpu.memory_space<vmem>>
      %190 = tpu.memref_slice %arg5[%c15_i32_134] : memref<32x!tpu.dma_semaphore, #tpu.memory_space<semaphore_mem>> -> memref<1x!tpu.dma_semaphore, #tpu.memory_space<semaphore_mem>>
      %191 = tpu.memref_squeeze %190 : memref<1x!tpu.dma_semaphore, #tpu.memory_space<semaphore_mem>> -> memref<!tpu.dma_semaphore, #tpu.memory_space<semaphore_mem>>
      tpu.enqueue_dma source(%188 : memref<1x128xf32, #tpu.memory_space<any>>) target(%189 : memref<1x128xf32, #tpu.memory_space<vmem>>) target_semaphore(%191 : memref<!tpu.dma_semaphore, #tpu.memory_space<semaphore_mem>>)
    } else {
    }
    %c1_i32_1 = arith.constant 1 : i32
    %4 = arith.addi %arg0, %c1_i32_1 : i32
    %c1_i32_2 = arith.constant 1 : i32
    %5 = arith.cmpi slt, %4, %c1_i32_2 : i32
    %6 = arith.extui %5 : i1 to i32
    %c0_i32_3 = arith.constant 0 : i32
    %7 = arith.cmpi ne, %6, %c0_i32_3 : i32
    scf.if %7 {
      %c1_i32_73 = arith.constant 1 : i32
      %112 = arith.addi %arg0, %c1_i32_73 : i32
      %c1_i32_74 = arith.constant 1 : i32
      %113 = arith.subi %c1_i32_74, %0 : i32
      %c16_i32_75 = arith.constant 16 : i32
      %114 = arith.muli %112, %c16_i32_75 : i32
      %c16_i32_76 = arith.constant 16 : i32
      %115 = arith.muli %113, %c16_i32_76 : i32
      %c0_i32_77 = arith.constant 0 : i32
      %116 = arith.addi %114, %c0_i32_77 : i32
      %117 = arith.index_cast %116 : i32 to index
      %118 = memref.load %arg1[%117] : memref<16xi32, #tpu.memory_space<smem>>
      %c0_i32_78 = arith.constant 0 : i32
      %119 = arith.addi %115, %c0_i32_78 : i32
      %c0_i32_79 = arith.constant 0 : i32
      %120 = arith.addi %115, %c0_i32_79 : i32
      %c0_i32_80 = arith.constant 0 : i32
      %121 = tpu.memref_slice %arg2[%118, %c0_i32_80] : memref<512x128xf32, #tpu.memory_space<any>> -> memref<1x128xf32, #tpu.memory_space<any>>
      %c0_i32_81 = arith.constant 0 : i32
      %122 = tpu.memref_slice %arg4[%119, %c0_i32_81] : memref<32x128xf32, #tpu.memory_space<vmem>> -> memref<1x128xf32, #tpu.memory_space<vmem>>
      %123 = tpu.memref_slice %arg5[%120] : memref<32x!tpu.dma_semaphore, #tpu.memory_space<semaphore_mem>> -> memref<1x!tpu.dma_semaphore, #tpu.memory_space<semaphore_mem>>
      %124 = tpu.memref_squeeze %123 : memref<1x!tpu.dma_semaphore, #tpu.memory_space<semaphore_mem>> -> memref<!tpu.dma_semaphore, #tpu.memory_space<semaphore_mem>>
      tpu.enqueue_dma source(%121 : memref<1x128xf32, #tpu.memory_space<any>>) target(%122 : memref<1x128xf32, #tpu.memory_space<vmem>>) target_semaphore(%124 : memref<!tpu.dma_semaphore, #tpu.memory_space<semaphore_mem>>)
      %c1_i32_82 = arith.constant 1 : i32
      %125 = arith.addi %114, %c1_i32_82 : i32
      %126 = arith.index_cast %125 : i32 to index
      %127 = memref.load %arg1[%126] : memref<16xi32, #tpu.memory_space<smem>>
      %c1_i32_83 = arith.constant 1 : i32
      %128 = arith.addi %115, %c1_i32_83 : i32
      %c1_i32_84 = arith.constant 1 : i32
      %129 = arith.addi %115, %c1_i32_84 : i32
      %c0_i32_85 = arith.constant 0 : i32
      %130 = tpu.memref_slice %arg2[%127, %c0_i32_85] : memref<512x128xf32, #tpu.memory_space<any>> -> memref<1x128xf32, #tpu.memory_space<any>>
      %c0_i32_86 = arith.constant 0 : i32
      %131 = tpu.memref_slice %arg4[%128, %c0_i32_86] : memref<32x128xf32, #tpu.memory_space<vmem>> -> memref<1x128xf32, #tpu.memory_space<vmem>>
      %132 = tpu.memref_slice %arg5[%129] : memref<32x!tpu.dma_semaphore, #tpu.memory_space<semaphore_mem>> -> memref<1x!tpu.dma_semaphore, #tpu.memory_space<semaphore_mem>>
      %133 = tpu.memref_squeeze %132 : memref<1x!tpu.dma_semaphore, #tpu.memory_space<semaphore_mem>> -> memref<!tpu.dma_semaphore, #tpu.memory_space<semaphore_mem>>
      tpu.enqueue_dma source(%130 : memref<1x128xf32, #tpu.memory_space<any>>) target(%131 : memref<1x128xf32, #tpu.memory_space<vmem>>) target_semaphore(%133 : memref<!tpu.dma_semaphore, #tpu.memory_space<semaphore_mem>>)
      %c2_i32_87 = arith.constant 2 : i32
      %134 = arith.addi %114, %c2_i32_87 : i32
      %135 = arith.index_cast %134 : i32 to index
      %136 = memref.load %arg1[%135] : memref<16xi32, #tpu.memory_space<smem>>
      %c2_i32_88 = arith.constant 2 : i32
      %137 = arith.addi %115, %c2_i32_88 : i32
      %c2_i32_89 = arith.constant 2 : i32
      %138 = arith.addi %115, %c2_i32_89 : i32
      %c0_i32_90 = arith.constant 0 : i32
      %139 = tpu.memref_slice %arg2[%136, %c0_i32_90] : memref<512x128xf32, #tpu.memory_space<any>> -> memref<1x128xf32, #tpu.memory_space<any>>
      %c0_i32_91 = arith.constant 0 : i32
      %140 = tpu.memref_slice %arg4[%137, %c0_i32_91] : memref<32x128xf32, #tpu.memory_space<vmem>> -> memref<1x128xf32, #tpu.memory_space<vmem>>
      %141 = tpu.memref_slice %arg5[%138] : memref<32x!tpu.dma_semaphore, #tpu.memory_space<semaphore_mem>> -> memref<1x!tpu.dma_semaphore, #tpu.memory_space<semaphore_mem>>
      %142 = tpu.memref_squeeze %141 : memref<1x!tpu.dma_semaphore, #tpu.memory_space<semaphore_mem>> -> memref<!tpu.dma_semaphore, #tpu.memory_space<semaphore_mem>>
      tpu.enqueue_dma source(%139 : memref<1x128xf32, #tpu.memory_space<any>>) target(%140 : memref<1x128xf32, #tpu.memory_space<vmem>>) target_semaphore(%142 : memref<!tpu.dma_semaphore, #tpu.memory_space<semaphore_mem>>)
      %c3_i32_92 = arith.constant 3 : i32
      %143 = arith.addi %114, %c3_i32_92 : i32
      %144 = arith.index_cast %143 : i32 to index
      %145 = memref.load %arg1[%144] : memref<16xi32, #tpu.memory_space<smem>>
      %c3_i32_93 = arith.constant 3 : i32
      %146 = arith.addi %115, %c3_i32_93 : i32
      %c3_i32_94 = arith.constant 3 : i32
      %147 = arith.addi %115, %c3_i32_94 : i32
      %c0_i32_95 = arith.constant 0 : i32
      %148 = tpu.memref_slice %arg2[%145, %c0_i32_95] : memref<512x128xf32, #tpu.memory_space<any>> -> memref<1x128xf32, #tpu.memory_space<any>>
      %c0_i32_96 = arith.constant 0 : i32
      %149 = tpu.memref_slice %arg4[%146, %c0_i32_96] : memref<32x128xf32, #tpu.memory_space<vmem>> -> memref<1x128xf32, #tpu.memory_space<vmem>>
      %150 = tpu.memref_slice %arg5[%147] : memref<32x!tpu.dma_semaphore, #tpu.memory_space<semaphore_mem>> -> memref<1x!tpu.dma_semaphore, #tpu.memory_space<semaphore_mem>>
      %151 = tpu.memref_squeeze %150 : memref<1x!tpu.dma_semaphore, #tpu.memory_space<semaphore_mem>> -> memref<!tpu.dma_semaphore, #tpu.memory_space<semaphore_mem>>
      tpu.enqueue_dma source(%148 : memref<1x128xf32, #tpu.memory_space<any>>) target(%149 : memref<1x128xf32, #tpu.memory_space<vmem>>) target_semaphore(%151 : memref<!tpu.dma_semaphore, #tpu.memory_space<semaphore_mem>>)
      %c4_i32_97 = arith.constant 4 : i32
      %152 = arith.addi %114, %c4_i32_97 : i32
      %153 = arith.index_cast %152 : i32 to index
      %154 = memref.load %arg1[%153] : memref<16xi32, #tpu.memory_space<smem>>
      %c4_i32_98 = arith.constant 4 : i32
      %155 = arith.addi %115, %c4_i32_98 : i32
      %c4_i32_99 = arith.constant 4 : i32
      %156 = arith.addi %115, %c4_i32_99 : i32
      %c0_i32_100 = arith.constant 0 : i32
      %157 = tpu.memref_slice %arg2[%154, %c0_i32_100] : memref<512x128xf32, #tpu.memory_space<any>> -> memref<1x128xf32, #tpu.memory_space<any>>
      %c0_i32_101 = arith.constant 0 : i32
      %158 = tpu.memref_slice %arg4[%155, %c0_i32_101] : memref<32x128xf32, #tpu.memory_space<vmem>> -> memref<1x128xf32, #tpu.memory_space<vmem>>
      %159 = tpu.memref_slice %arg5[%156] : memref<32x!tpu.dma_semaphore, #tpu.memory_space<semaphore_mem>> -> memref<1x!tpu.dma_semaphore, #tpu.memory_space<semaphore_mem>>
      %160 = tpu.memref_squeeze %159 : memref<1x!tpu.dma_semaphore, #tpu.memory_space<semaphore_mem>> -> memref<!tpu.dma_semaphore, #tpu.memory_space<semaphore_mem>>
      tpu.enqueue_dma source(%157 : memref<1x128xf32, #tpu.memory_space<any>>) target(%158 : memref<1x128xf32, #tpu.memory_space<vmem>>) target_semaphore(%160 : memref<!tpu.dma_semaphore, #tpu.memory_space<semaphore_mem>>)
      %c5_i32_102 = arith.constant 5 : i32
      %161 = arith.addi %114, %c5_i32_102 : i32
      %162 = arith.index_cast %161 : i32 to index
      %163 = memref.load %arg1[%162] : memref<16xi32, #tpu.memory_space<smem>>
      %c5_i32_103 = arith.constant 5 : i32
      %164 = arith.addi %115, %c5_i32_103 : i32
      %c5_i32_104 = arith.constant 5 : i32
      %165 = arith.addi %115, %c5_i32_104 : i32
      %c0_i32_105 = arith.constant 0 : i32
      %166 = tpu.memref_slice %arg2[%163, %c0_i32_105] : memref<512x128xf32, #tpu.memory_space<any>> -> memref<1x128xf32, #tpu.memory_space<any>>
      %c0_i32_106 = arith.constant 0 : i32
      %167 = tpu.memref_slice %arg4[%164, %c0_i32_106] : memref<32x128xf32, #tpu.memory_space<vmem>> -> memref<1x128xf32, #tpu.memory_space<vmem>>
      %168 = tpu.memref_slice %arg5[%165] : memref<32x!tpu.dma_semaphore, #tpu.memory_space<semaphore_mem>> -> memref<1x!tpu.dma_semaphore, #tpu.memory_space<semaphore_mem>>
      %169 = tpu.memref_squeeze %168 : memref<1x!tpu.dma_semaphore, #tpu.memory_space<semaphore_mem>> -> memref<!tpu.dma_semaphore, #tpu.memory_space<semaphore_mem>>
      tpu.enqueue_dma source(%166 : memref<1x128xf32, #tpu.memory_space<any>>) target(%167 : memref<1x128xf32, #tpu.memory_space<vmem>>) target_semaphore(%169 : memref<!tpu.dma_semaphore, #tpu.memory_space<semaphore_mem>>)
      %c6_i32_107 = arith.constant 6 : i32
      %170 = arith.addi %114, %c6_i32_107 : i32
      %171 = arith.index_cast %170 : i32 to index
      %172 = memref.load %arg1[%171] : memref<16xi32, #tpu.memory_space<smem>>
      %c6_i32_108 = arith.constant 6 : i32
      %173 = arith.addi %115, %c6_i32_108 : i32
      %c6_i32_109 = arith.constant 6 : i32
      %174 = arith.addi %115, %c6_i32_109 : i32
      %c0_i32_110 = arith.constant 0 : i32
      %175 = tpu.memref_slice %arg2[%172, %c0_i32_110] : memref<512x128xf32, #tpu.memory_space<any>> -> memref<1x128xf32, #tpu.memory_space<any>>
      %c0_i32_111 = arith.constant 0 : i32
      %176 = tpu.memref_slice %arg4[%173, %c0_i32_111] : memref<32x128xf32, #tpu.memory_space<vmem>> -> memref<1x128xf32, #tpu.memory_space<vmem>>
      %177 = tpu.memref_slice %arg5[%174] : memref<32x!tpu.dma_semaphore, #tpu.memory_space<semaphore_mem>> -> memref<1x!tpu.dma_semaphore, #tpu.memory_space<semaphore_mem>>
      %178 = tpu.memref_squeeze %177 : memref<1x!tpu.dma_semaphore, #tpu.memory_space<semaphore_mem>> -> memref<!tpu.dma_semaphore, #tpu.memory_space<semaphore_mem>>
      tpu.enqueue_dma source(%175 : memref<1x128xf32, #tpu.memory_space<any>>) target(%176 : memref<1x128xf32, #tpu.memory_space<vmem>>) target_semaphore(%178 : memref<!tpu.dma_semaphore, #tpu.memory_space<semaphore_mem>>)
      %c7_i32_112 = arith.constant 7 : i32
      %179 = arith.addi %114, %c7_i32_112 : i32
      %180 = arith.index_cast %179 : i32 to index
      %181 = memref.load %arg1[%180] : memref<16xi32, #tpu.memory_space<smem>>
      %c7_i32_113 = arith.constant 7 : i32
      %182 = arith.addi %115, %c7_i32_113 : i32
      %c7_i32_114 = arith.constant 7 : i32
      %183 = arith.addi %115, %c7_i32_114 : i32
      %c0_i32_115 = arith.constant 0 : i32
      %184 = tpu.memref_slice %arg2[%181, %c0_i32_115] : memref<512x128xf32, #tpu.memory_space<any>> -> memref<1x128xf32, #tpu.memory_space<any>>
      %c0_i32_116 = arith.constant 0 : i32
      %185 = tpu.memref_slice %arg4[%182, %c0_i32_116] : memref<32x128xf32, #tpu.memory_space<vmem>> -> memref<1x128xf32, #tpu.memory_space<vmem>>
      %186 = tpu.memref_slice %arg5[%183] : memref<32x!tpu.dma_semaphore, #tpu.memory_space<semaphore_mem>> -> memref<1x!tpu.dma_semaphore, #tpu.memory_space<semaphore_mem>>
      %187 = tpu.memref_squeeze %186 : memref<1x!tpu.dma_semaphore, #tpu.memory_space<semaphore_mem>> -> memref<!tpu.dma_semaphore, #tpu.memory_space<semaphore_mem>>
      tpu.enqueue_dma source(%184 : memref<1x128xf32, #tpu.memory_space<any>>) target(%185 : memref<1x128xf32, #tpu.memory_space<vmem>>) target_semaphore(%187 : memref<!tpu.dma_semaphore, #tpu.memory_space<semaphore_mem>>)
      %c8_i32_117 = arith.constant 8 : i32
      %188 = arith.addi %114, %c8_i32_117 : i32
      %189 = arith.index_cast %188 : i32 to index
      %190 = memref.load %arg1[%189] : memref<16xi32, #tpu.memory_space<smem>>
      %c8_i32_118 = arith.constant 8 : i32
      %191 = arith.addi %115, %c8_i32_118 : i32
      %c8_i32_119 = arith.constant 8 : i32
      %192 = arith.addi %115, %c8_i32_119 : i32
      %c0_i32_120 = arith.constant 0 : i32
      %193 = tpu.memref_slice %arg2[%190, %c0_i32_120] : memref<512x128xf32, #tpu.memory_space<any>> -> memref<1x128xf32, #tpu.memory_space<any>>
      %c0_i32_121 = arith.constant 0 : i32
      %194 = tpu.memref_slice %arg4[%191, %c0_i32_121] : memref<32x128xf32, #tpu.memory_space<vmem>> -> memref<1x128xf32, #tpu.memory_space<vmem>>
      %195 = tpu.memref_slice %arg5[%192] : memref<32x!tpu.dma_semaphore, #tpu.memory_space<semaphore_mem>> -> memref<1x!tpu.dma_semaphore, #tpu.memory_space<semaphore_mem>>
      %196 = tpu.memref_squeeze %195 : memref<1x!tpu.dma_semaphore, #tpu.memory_space<semaphore_mem>> -> memref<!tpu.dma_semaphore, #tpu.memory_space<semaphore_mem>>
      tpu.enqueue_dma source(%193 : memref<1x128xf32, #tpu.memory_space<any>>) target(%194 : memref<1x128xf32, #tpu.memory_space<vmem>>) target_semaphore(%196 : memref<!tpu.dma_semaphore, #tpu.memory_space<semaphore_mem>>)
      %c9_i32_122 = arith.constant 9 : i32
      %197 = arith.addi %114, %c9_i32_122 : i32
      %198 = arith.index_cast %197 : i32 to index
      %199 = memref.load %arg1[%198] : memref<16xi32, #tpu.memory_space<smem>>
      %c9_i32_123 = arith.constant 9 : i32
      %200 = arith.addi %115, %c9_i32_123 : i32
      %c9_i32_124 = arith.constant 9 : i32
      %201 = arith.addi %115, %c9_i32_124 : i32
      %c0_i32_125 = arith.constant 0 : i32
      %202 = tpu.memref_slice %arg2[%199, %c0_i32_125] : memref<512x128xf32, #tpu.memory_space<any>> -> memref<1x128xf32, #tpu.memory_space<any>>
      %c0_i32_126 = arith.constant 0 : i32
      %203 = tpu.memref_slice %arg4[%200, %c0_i32_126] : memref<32x128xf32, #tpu.memory_space<vmem>> -> memref<1x128xf32, #tpu.memory_space<vmem>>
      %204 = tpu.memref_slice %arg5[%201] : memref<32x!tpu.dma_semaphore, #tpu.memory_space<semaphore_mem>> -> memref<1x!tpu.dma_semaphore, #tpu.memory_space<semaphore_mem>>
      %205 = tpu.memref_squeeze %204 : memref<1x!tpu.dma_semaphore, #tpu.memory_space<semaphore_mem>> -> memref<!tpu.dma_semaphore, #tpu.memory_space<semaphore_mem>>
      tpu.enqueue_dma source(%202 : memref<1x128xf32, #tpu.memory_space<any>>) target(%203 : memref<1x128xf32, #tpu.memory_space<vmem>>) target_semaphore(%205 : memref<!tpu.dma_semaphore, #tpu.memory_space<semaphore_mem>>)
      %c10_i32_127 = arith.constant 10 : i32
      %206 = arith.addi %114, %c10_i32_127 : i32
      %207 = arith.index_cast %206 : i32 to index
      %208 = memref.load %arg1[%207] : memref<16xi32, #tpu.memory_space<smem>>
      %c10_i32_128 = arith.constant 10 : i32
      %209 = arith.addi %115, %c10_i32_128 : i32
      %c10_i32_129 = arith.constant 10 : i32
      %210 = arith.addi %115, %c10_i32_129 : i32
      %c0_i32_130 = arith.constant 0 : i32
      %211 = tpu.memref_slice %arg2[%208, %c0_i32_130] : memref<512x128xf32, #tpu.memory_space<any>> -> memref<1x128xf32, #tpu.memory_space<any>>
      %c0_i32_131 = arith.constant 0 : i32
      %212 = tpu.memref_slice %arg4[%209, %c0_i32_131] : memref<32x128xf32, #tpu.memory_space<vmem>> -> memref<1x128xf32, #tpu.memory_space<vmem>>
      %213 = tpu.memref_slice %arg5[%210] : memref<32x!tpu.dma_semaphore, #tpu.memory_space<semaphore_mem>> -> memref<1x!tpu.dma_semaphore, #tpu.memory_space<semaphore_mem>>
      %214 = tpu.memref_squeeze %213 : memref<1x!tpu.dma_semaphore, #tpu.memory_space<semaphore_mem>> -> memref<!tpu.dma_semaphore, #tpu.memory_space<semaphore_mem>>
      tpu.enqueue_dma source(%211 : memref<1x128xf32, #tpu.memory_space<any>>) target(%212 : memref<1x128xf32, #tpu.memory_space<vmem>>) target_semaphore(%214 : memref<!tpu.dma_semaphore, #tpu.memory_space<semaphore_mem>>)
      %c11_i32_132 = arith.constant 11 : i32
      %215 = arith.addi %114, %c11_i32_132 : i32
      %216 = arith.index_cast %215 : i32 to index
      %217 = memref.load %arg1[%216] : memref<16xi32, #tpu.memory_space<smem>>
      %c11_i32_133 = arith.constant 11 : i32
      %218 = arith.addi %115, %c11_i32_133 : i32
      %c11_i32_134 = arith.constant 11 : i32
      %219 = arith.addi %115, %c11_i32_134 : i32
      %c0_i32_135 = arith.constant 0 : i32
      %220 = tpu.memref_slice %arg2[%217, %c0_i32_135] : memref<512x128xf32, #tpu.memory_space<any>> -> memref<1x128xf32, #tpu.memory_space<any>>
      %c0_i32_136 = arith.constant 0 : i32
      %221 = tpu.memref_slice %arg4[%218, %c0_i32_136] : memref<32x128xf32, #tpu.memory_space<vmem>> -> memref<1x128xf32, #tpu.memory_space<vmem>>
      %222 = tpu.memref_slice %arg5[%219] : memref<32x!tpu.dma_semaphore, #tpu.memory_space<semaphore_mem>> -> memref<1x!tpu.dma_semaphore, #tpu.memory_space<semaphore_mem>>
      %223 = tpu.memref_squeeze %222 : memref<1x!tpu.dma_semaphore, #tpu.memory_space<semaphore_mem>> -> memref<!tpu.dma_semaphore, #tpu.memory_space<semaphore_mem>>
      tpu.enqueue_dma source(%220 : memref<1x128xf32, #tpu.memory_space<any>>) target(%221 : memref<1x128xf32, #tpu.memory_space<vmem>>) target_semaphore(%223 : memref<!tpu.dma_semaphore, #tpu.memory_space<semaphore_mem>>)
      %c12_i32_137 = arith.constant 12 : i32
      %224 = arith.addi %114, %c12_i32_137 : i32
      %225 = arith.index_cast %224 : i32 to index
      %226 = memref.load %arg1[%225] : memref<16xi32, #tpu.memory_space<smem>>
      %c12_i32_138 = arith.constant 12 : i32
      %227 = arith.addi %115, %c12_i32_138 : i32
      %c12_i32_139 = arith.constant 12 : i32
      %228 = arith.addi %115, %c12_i32_139 : i32
      %c0_i32_140 = arith.constant 0 : i32
      %229 = tpu.memref_slice %arg2[%226, %c0_i32_140] : memref<512x128xf32, #tpu.memory_space<any>> -> memref<1x128xf32, #tpu.memory_space<any>>
      %c0_i32_141 = arith.constant 0 : i32
      %230 = tpu.memref_slice %arg4[%227, %c0_i32_141] : memref<32x128xf32, #tpu.memory_space<vmem>> -> memref<1x128xf32, #tpu.memory_space<vmem>>
      %231 = tpu.memref_slice %arg5[%228] : memref<32x!tpu.dma_semaphore, #tpu.memory_space<semaphore_mem>> -> memref<1x!tpu.dma_semaphore, #tpu.memory_space<semaphore_mem>>
      %232 = tpu.memref_squeeze %231 : memref<1x!tpu.dma_semaphore, #tpu.memory_space<semaphore_mem>> -> memref<!tpu.dma_semaphore, #tpu.memory_space<semaphore_mem>>
      tpu.enqueue_dma source(%229 : memref<1x128xf32, #tpu.memory_space<any>>) target(%230 : memref<1x128xf32, #tpu.memory_space<vmem>>) target_semaphore(%232 : memref<!tpu.dma_semaphore, #tpu.memory_space<semaphore_mem>>)
      %c13_i32_142 = arith.constant 13 : i32
      %233 = arith.addi %114, %c13_i32_142 : i32
      %234 = arith.index_cast %233 : i32 to index
      %235 = memref.load %arg1[%234] : memref<16xi32, #tpu.memory_space<smem>>
      %c13_i32_143 = arith.constant 13 : i32
      %236 = arith.addi %115, %c13_i32_143 : i32
      %c13_i32_144 = arith.constant 13 : i32
      %237 = arith.addi %115, %c13_i32_144 : i32
      %c0_i32_145 = arith.constant 0 : i32
      %238 = tpu.memref_slice %arg2[%235, %c0_i32_145] : memref<512x128xf32, #tpu.memory_space<any>> -> memref<1x128xf32, #tpu.memory_space<any>>
      %c0_i32_146 = arith.constant 0 : i32
      %239 = tpu.memref_slice %arg4[%236, %c0_i32_146] : memref<32x128xf32, #tpu.memory_space<vmem>> -> memref<1x128xf32, #tpu.memory_space<vmem>>
      %240 = tpu.memref_slice %arg5[%237] : memref<32x!tpu.dma_semaphore, #tpu.memory_space<semaphore_mem>> -> memref<1x!tpu.dma_semaphore, #tpu.memory_space<semaphore_mem>>
      %241 = tpu.memref_squeeze %240 : memref<1x!tpu.dma_semaphore, #tpu.memory_space<semaphore_mem>> -> memref<!tpu.dma_semaphore, #tpu.memory_space<semaphore_mem>>
      tpu.enqueue_dma source(%238 : memref<1x128xf32, #tpu.memory_space<any>>) target(%239 : memref<1x128xf32, #tpu.memory_space<vmem>>) target_semaphore(%241 : memref<!tpu.dma_semaphore, #tpu.memory_space<semaphore_mem>>)
      %c14_i32_147 = arith.constant 14 : i32
      %242 = arith.addi %114, %c14_i32_147 : i32
      %243 = arith.index_cast %242 : i32 to index
      %244 = memref.load %arg1[%243] : memref<16xi32, #tpu.memory_space<smem>>
      %c14_i32_148 = arith.constant 14 : i32
      %245 = arith.addi %115, %c14_i32_148 : i32
      %c14_i32_149 = arith.constant 14 : i32
      %246 = arith.addi %115, %c14_i32_149 : i32
      %c0_i32_150 = arith.constant 0 : i32
      %247 = tpu.memref_slice %arg2[%244, %c0_i32_150] : memref<512x128xf32, #tpu.memory_space<any>> -> memref<1x128xf32, #tpu.memory_space<any>>
      %c0_i32_151 = arith.constant 0 : i32
      %248 = tpu.memref_slice %arg4[%245, %c0_i32_151] : memref<32x128xf32, #tpu.memory_space<vmem>> -> memref<1x128xf32, #tpu.memory_space<vmem>>
      %249 = tpu.memref_slice %arg5[%246] : memref<32x!tpu.dma_semaphore, #tpu.memory_space<semaphore_mem>> -> memref<1x!tpu.dma_semaphore, #tpu.memory_space<semaphore_mem>>
      %250 = tpu.memref_squeeze %249 : memref<1x!tpu.dma_semaphore, #tpu.memory_space<semaphore_mem>> -> memref<!tpu.dma_semaphore, #tpu.memory_space<semaphore_mem>>
      tpu.enqueue_dma source(%247 : memref<1x128xf32, #tpu.memory_space<any>>) target(%248 : memref<1x128xf32, #tpu.memory_space<vmem>>) target_semaphore(%250 : memref<!tpu.dma_semaphore, #tpu.memory_space<semaphore_mem>>)
      %c15_i32_152 = arith.constant 15 : i32
      %251 = arith.addi %114, %c15_i32_152 : i32
      %252 = arith.index_cast %251 : i32 to index
      %253 = memref.load %arg1[%252] : memref<16xi32, #tpu.memory_space<smem>>
      %c15_i32_153 = arith.constant 15 : i32
      %254 = arith.addi %115, %c15_i32_153 : i32
      %c15_i32_154 = arith.constant 15 : i32
      %255 = arith.addi %115, %c15_i32_154 : i32
      %c0_i32_155 = arith.constant 0 : i32
      %256 = tpu.memref_slice %arg2[%253, %c0_i32_155] : memref<512x128xf32, #tpu.memory_space<any>> -> memref<1x128xf32, #tpu.memory_space<any>>
      %c0_i32_156 = arith.constant 0 : i32
      %257 = tpu.memref_slice %arg4[%254, %c0_i32_156] : memref<32x128xf32, #tpu.memory_space<vmem>> -> memref<1x128xf32, #tpu.memory_space<vmem>>
      %258 = tpu.memref_slice %arg5[%255] : memref<32x!tpu.dma_semaphore, #tpu.memory_space<semaphore_mem>> -> memref<1x!tpu.dma_semaphore, #tpu.memory_space<semaphore_mem>>
      %259 = tpu.memref_squeeze %258 : memref<1x!tpu.dma_semaphore, #tpu.memory_space<semaphore_mem>> -> memref<!tpu.dma_semaphore, #tpu.memory_space<semaphore_mem>>
      tpu.enqueue_dma source(%256 : memref<1x128xf32, #tpu.memory_space<any>>) target(%257 : memref<1x128xf32, #tpu.memory_space<vmem>>) target_semaphore(%259 : memref<!tpu.dma_semaphore, #tpu.memory_space<semaphore_mem>>)
    } else {
    }
    %c16_i32 = arith.constant 16 : i32
    %8 = arith.muli %0, %c16_i32 : i32
    %c0_i32_4 = arith.constant 0 : i32
    %9 = arith.addi %8, %c0_i32_4 : i32
    %c0_i32_5 = arith.constant 0 : i32
    %10 = arith.addi %8, %c0_i32_5 : i32
    %c0_i32_6 = arith.constant 0 : i32
    %c0_i32_7 = arith.constant 0 : i32
    %11 = tpu.memref_slice %arg2[%c0_i32_6, %c0_i32_7] : memref<512x128xf32, #tpu.memory_space<any>> -> memref<1x128xf32, #tpu.memory_space<any>>
    %c0_i32_8 = arith.constant 0 : i32
    %12 = tpu.memref_slice %arg4[%9, %c0_i32_8] : memref<32x128xf32, #tpu.memory_space<vmem>> -> memref<1x128xf32, #tpu.memory_space<vmem>>
    %13 = tpu.memref_slice %arg5[%10] : memref<32x!tpu.dma_semaphore, #tpu.memory_space<semaphore_mem>> -> memref<1x!tpu.dma_semaphore, #tpu.memory_space<semaphore_mem>>
    %14 = tpu.memref_squeeze %13 : memref<1x!tpu.dma_semaphore, #tpu.memory_space<semaphore_mem>> -> memref<!tpu.dma_semaphore, #tpu.memory_space<semaphore_mem>>
    tpu.wait_dma2 semaphore(%14 : memref<!tpu.dma_semaphore, #tpu.memory_space<semaphore_mem>>) src(%11 : memref<1x128xf32, #tpu.memory_space<any>>) dst(%12 : memref<1x128xf32, #tpu.memory_space<vmem>>)
    %c1_i32_9 = arith.constant 1 : i32
    %15 = arith.addi %8, %c1_i32_9 : i32
    %c1_i32_10 = arith.constant 1 : i32
    %16 = arith.addi %8, %c1_i32_10 : i32
    %c0_i32_11 = arith.constant 0 : i32
    %c0_i32_12 = arith.constant 0 : i32
    %17 = tpu.memref_slice %arg2[%c0_i32_11, %c0_i32_12] : memref<512x128xf32, #tpu.memory_space<any>> -> memref<1x128xf32, #tpu.memory_space<any>>
    %c0_i32_13 = arith.constant 0 : i32
    %18 = tpu.memref_slice %arg4[%15, %c0_i32_13] : memref<32x128xf32, #tpu.memory_space<vmem>> -> memref<1x128xf32, #tpu.memory_space<vmem>>
    %19 = tpu.memref_slice %arg5[%16] : memref<32x!tpu.dma_semaphore, #tpu.memory_space<semaphore_mem>> -> memref<1x!tpu.dma_semaphore, #tpu.memory_space<semaphore_mem>>
    %20 = tpu.memref_squeeze %19 : memref<1x!tpu.dma_semaphore, #tpu.memory_space<semaphore_mem>> -> memref<!tpu.dma_semaphore, #tpu.memory_space<semaphore_mem>>
    tpu.wait_dma2 semaphore(%20 : memref<!tpu.dma_semaphore, #tpu.memory_space<semaphore_mem>>) src(%17 : memref<1x128xf32, #tpu.memory_space<any>>) dst(%18 : memref<1x128xf32, #tpu.memory_space<vmem>>)
    %c2_i32 = arith.constant 2 : i32
    %21 = arith.addi %8, %c2_i32 : i32
    %c2_i32_14 = arith.constant 2 : i32
    %22 = arith.addi %8, %c2_i32_14 : i32
    %c0_i32_15 = arith.constant 0 : i32
    %c0_i32_16 = arith.constant 0 : i32
    %23 = tpu.memref_slice %arg2[%c0_i32_15, %c0_i32_16] : memref<512x128xf32, #tpu.memory_space<any>> -> memref<1x128xf32, #tpu.memory_space<any>>
    %c0_i32_17 = arith.constant 0 : i32
    %24 = tpu.memref_slice %arg4[%21, %c0_i32_17] : memref<32x128xf32, #tpu.memory_space<vmem>> -> memref<1x128xf32, #tpu.memory_space<vmem>>
    %25 = tpu.memref_slice %arg5[%22] : memref<32x!tpu.dma_semaphore, #tpu.memory_space<semaphore_mem>> -> memref<1x!tpu.dma_semaphore, #tpu.memory_space<semaphore_mem>>
    %26 = tpu.memref_squeeze %25 : memref<1x!tpu.dma_semaphore, #tpu.memory_space<semaphore_mem>> -> memref<!tpu.dma_semaphore, #tpu.memory_space<semaphore_mem>>
    tpu.wait_dma2 semaphore(%26 : memref<!tpu.dma_semaphore, #tpu.memory_space<semaphore_mem>>) src(%23 : memref<1x128xf32, #tpu.memory_space<any>>) dst(%24 : memref<1x128xf32, #tpu.memory_space<vmem>>)
    %c3_i32 = arith.constant 3 : i32
    %27 = arith.addi %8, %c3_i32 : i32
    %c3_i32_18 = arith.constant 3 : i32
    %28 = arith.addi %8, %c3_i32_18 : i32
    %c0_i32_19 = arith.constant 0 : i32
    %c0_i32_20 = arith.constant 0 : i32
    %29 = tpu.memref_slice %arg2[%c0_i32_19, %c0_i32_20] : memref<512x128xf32, #tpu.memory_space<any>> -> memref<1x128xf32, #tpu.memory_space<any>>
    %c0_i32_21 = arith.constant 0 : i32
    %30 = tpu.memref_slice %arg4[%27, %c0_i32_21] : memref<32x128xf32, #tpu.memory_space<vmem>> -> memref<1x128xf32, #tpu.memory_space<vmem>>
    %31 = tpu.memref_slice %arg5[%28] : memref<32x!tpu.dma_semaphore, #tpu.memory_space<semaphore_mem>> -> memref<1x!tpu.dma_semaphore, #tpu.memory_space<semaphore_mem>>
    %32 = tpu.memref_squeeze %31 : memref<1x!tpu.dma_semaphore, #tpu.memory_space<semaphore_mem>> -> memref<!tpu.dma_semaphore, #tpu.memory_space<semaphore_mem>>
    tpu.wait_dma2 semaphore(%32 : memref<!tpu.dma_semaphore, #tpu.memory_space<semaphore_mem>>) src(%29 : memref<1x128xf32, #tpu.memory_space<any>>) dst(%30 : memref<1x128xf32, #tpu.memory_space<vmem>>)
    %c4_i32 = arith.constant 4 : i32
    %33 = arith.addi %8, %c4_i32 : i32
    %c4_i32_22 = arith.constant 4 : i32
    %34 = arith.addi %8, %c4_i32_22 : i32
    %c0_i32_23 = arith.constant 0 : i32
    %c0_i32_24 = arith.constant 0 : i32
    %35 = tpu.memref_slice %arg2[%c0_i32_23, %c0_i32_24] : memref<512x128xf32, #tpu.memory_space<any>> -> memref<1x128xf32, #tpu.memory_space<any>>
    %c0_i32_25 = arith.constant 0 : i32
    %36 = tpu.memref_slice %arg4[%33, %c0_i32_25] : memref<32x128xf32, #tpu.memory_space<vmem>> -> memref<1x128xf32, #tpu.memory_space<vmem>>
    %37 = tpu.memref_slice %arg5[%34] : memref<32x!tpu.dma_semaphore, #tpu.memory_space<semaphore_mem>> -> memref<1x!tpu.dma_semaphore, #tpu.memory_space<semaphore_mem>>
    %38 = tpu.memref_squeeze %37 : memref<1x!tpu.dma_semaphore, #tpu.memory_space<semaphore_mem>> -> memref<!tpu.dma_semaphore, #tpu.memory_space<semaphore_mem>>
    tpu.wait_dma2 semaphore(%38 : memref<!tpu.dma_semaphore, #tpu.memory_space<semaphore_mem>>) src(%35 : memref<1x128xf32, #tpu.memory_space<any>>) dst(%36 : memref<1x128xf32, #tpu.memory_space<vmem>>)
    %c5_i32 = arith.constant 5 : i32
    %39 = arith.addi %8, %c5_i32 : i32
    %c5_i32_26 = arith.constant 5 : i32
    %40 = arith.addi %8, %c5_i32_26 : i32
    %c0_i32_27 = arith.constant 0 : i32
    %c0_i32_28 = arith.constant 0 : i32
    %41 = tpu.memref_slice %arg2[%c0_i32_27, %c0_i32_28] : memref<512x128xf32, #tpu.memory_space<any>> -> memref<1x128xf32, #tpu.memory_space<any>>
    %c0_i32_29 = arith.constant 0 : i32
    %42 = tpu.memref_slice %arg4[%39, %c0_i32_29] : memref<32x128xf32, #tpu.memory_space<vmem>> -> memref<1x128xf32, #tpu.memory_space<vmem>>
    %43 = tpu.memref_slice %arg5[%40] : memref<32x!tpu.dma_semaphore, #tpu.memory_space<semaphore_mem>> -> memref<1x!tpu.dma_semaphore, #tpu.memory_space<semaphore_mem>>
    %44 = tpu.memref_squeeze %43 : memref<1x!tpu.dma_semaphore, #tpu.memory_space<semaphore_mem>> -> memref<!tpu.dma_semaphore, #tpu.memory_space<semaphore_mem>>
    tpu.wait_dma2 semaphore(%44 : memref<!tpu.dma_semaphore, #tpu.memory_space<semaphore_mem>>) src(%41 : memref<1x128xf32, #tpu.memory_space<any>>) dst(%42 : memref<1x128xf32, #tpu.memory_space<vmem>>)
    %c6_i32 = arith.constant 6 : i32
    %45 = arith.addi %8, %c6_i32 : i32
    %c6_i32_30 = arith.constant 6 : i32
    %46 = arith.addi %8, %c6_i32_30 : i32
    %c0_i32_31 = arith.constant 0 : i32
    %c0_i32_32 = arith.constant 0 : i32
    %47 = tpu.memref_slice %arg2[%c0_i32_31, %c0_i32_32] : memref<512x128xf32, #tpu.memory_space<any>> -> memref<1x128xf32, #tpu.memory_space<any>>
    %c0_i32_33 = arith.constant 0 : i32
    %48 = tpu.memref_slice %arg4[%45, %c0_i32_33] : memref<32x128xf32, #tpu.memory_space<vmem>> -> memref<1x128xf32, #tpu.memory_space<vmem>>
    %49 = tpu.memref_slice %arg5[%46] : memref<32x!tpu.dma_semaphore, #tpu.memory_space<semaphore_mem>> -> memref<1x!tpu.dma_semaphore, #tpu.memory_space<semaphore_mem>>
    %50 = tpu.memref_squeeze %49 : memref<1x!tpu.dma_semaphore, #tpu.memory_space<semaphore_mem>> -> memref<!tpu.dma_semaphore, #tpu.memory_space<semaphore_mem>>
    tpu.wait_dma2 semaphore(%50 : memref<!tpu.dma_semaphore, #tpu.memory_space<semaphore_mem>>) src(%47 : memref<1x128xf32, #tpu.memory_space<any>>) dst(%48 : memref<1x128xf32, #tpu.memory_space<vmem>>)
    %c7_i32 = arith.constant 7 : i32
    %51 = arith.addi %8, %c7_i32 : i32
    %c7_i32_34 = arith.constant 7 : i32
    %52 = arith.addi %8, %c7_i32_34 : i32
    %c0_i32_35 = arith.constant 0 : i32
    %c0_i32_36 = arith.constant 0 : i32
    %53 = tpu.memref_slice %arg2[%c0_i32_35, %c0_i32_36] : memref<512x128xf32, #tpu.memory_space<any>> -> memref<1x128xf32, #tpu.memory_space<any>>
    %c0_i32_37 = arith.constant 0 : i32
    %54 = tpu.memref_slice %arg4[%51, %c0_i32_37] : memref<32x128xf32, #tpu.memory_space<vmem>> -> memref<1x128xf32, #tpu.memory_space<vmem>>
    %55 = tpu.memref_slice %arg5[%52] : memref<32x!tpu.dma_semaphore, #tpu.memory_space<semaphore_mem>> -> memref<1x!tpu.dma_semaphore, #tpu.memory_space<semaphore_mem>>
    %56 = tpu.memref_squeeze %55 : memref<1x!tpu.dma_semaphore, #tpu.memory_space<semaphore_mem>> -> memref<!tpu.dma_semaphore, #tpu.memory_space<semaphore_mem>>
    tpu.wait_dma2 semaphore(%56 : memref<!tpu.dma_semaphore, #tpu.memory_space<semaphore_mem>>) src(%53 : memref<1x128xf32, #tpu.memory_space<any>>) dst(%54 : memref<1x128xf32, #tpu.memory_space<vmem>>)
    %c8_i32 = arith.constant 8 : i32
    %57 = arith.addi %8, %c8_i32 : i32
    %c8_i32_38 = arith.constant 8 : i32
    %58 = arith.addi %8, %c8_i32_38 : i32
    %c0_i32_39 = arith.constant 0 : i32
    %c0_i32_40 = arith.constant 0 : i32
    %59 = tpu.memref_slice %arg2[%c0_i32_39, %c0_i32_40] : memref<512x128xf32, #tpu.memory_space<any>> -> memref<1x128xf32, #tpu.memory_space<any>>
    %c0_i32_41 = arith.constant 0 : i32
    %60 = tpu.memref_slice %arg4[%57, %c0_i32_41] : memref<32x128xf32, #tpu.memory_space<vmem>> -> memref<1x128xf32, #tpu.memory_space<vmem>>
    %61 = tpu.memref_slice %arg5[%58] : memref<32x!tpu.dma_semaphore, #tpu.memory_space<semaphore_mem>> -> memref<1x!tpu.dma_semaphore, #tpu.memory_space<semaphore_mem>>
    %62 = tpu.memref_squeeze %61 : memref<1x!tpu.dma_semaphore, #tpu.memory_space<semaphore_mem>> -> memref<!tpu.dma_semaphore, #tpu.memory_space<semaphore_mem>>
    tpu.wait_dma2 semaphore(%62 : memref<!tpu.dma_semaphore, #tpu.memory_space<semaphore_mem>>) src(%59 : memref<1x128xf32, #tpu.memory_space<any>>) dst(%60 : memref<1x128xf32, #tpu.memory_space<vmem>>)
    %c9_i32 = arith.constant 9 : i32
    %63 = arith.addi %8, %c9_i32 : i32
    %c9_i32_42 = arith.constant 9 : i32
    %64 = arith.addi %8, %c9_i32_42 : i32
    %c0_i32_43 = arith.constant 0 : i32
    %c0_i32_44 = arith.constant 0 : i32
    %65 = tpu.memref_slice %arg2[%c0_i32_43, %c0_i32_44] : memref<512x128xf32, #tpu.memory_space<any>> -> memref<1x128xf32, #tpu.memory_space<any>>
    %c0_i32_45 = arith.constant 0 : i32
    %66 = tpu.memref_slice %arg4[%63, %c0_i32_45] : memref<32x128xf32, #tpu.memory_space<vmem>> -> memref<1x128xf32, #tpu.memory_space<vmem>>
    %67 = tpu.memref_slice %arg5[%64] : memref<32x!tpu.dma_semaphore, #tpu.memory_space<semaphore_mem>> -> memref<1x!tpu.dma_semaphore, #tpu.memory_space<semaphore_mem>>
    %68 = tpu.memref_squeeze %67 : memref<1x!tpu.dma_semaphore, #tpu.memory_space<semaphore_mem>> -> memref<!tpu.dma_semaphore, #tpu.memory_space<semaphore_mem>>
    tpu.wait_dma2 semaphore(%68 : memref<!tpu.dma_semaphore, #tpu.memory_space<semaphore_mem>>) src(%65 : memref<1x128xf32, #tpu.memory_space<any>>) dst(%66 : memref<1x128xf32, #tpu.memory_space<vmem>>)
    %c10_i32 = arith.constant 10 : i32
    %69 = arith.addi %8, %c10_i32 : i32
    %c10_i32_46 = arith.constant 10 : i32
    %70 = arith.addi %8, %c10_i32_46 : i32
    %c0_i32_47 = arith.constant 0 : i32
    %c0_i32_48 = arith.constant 0 : i32
    %71 = tpu.memref_slice %arg2[%c0_i32_47, %c0_i32_48] : memref<512x128xf32, #tpu.memory_space<any>> -> memref<1x128xf32, #tpu.memory_space<any>>
    %c0_i32_49 = arith.constant 0 : i32
    %72 = tpu.memref_slice %arg4[%69, %c0_i32_49] : memref<32x128xf32, #tpu.memory_space<vmem>> -> memref<1x128xf32, #tpu.memory_space<vmem>>
    %73 = tpu.memref_slice %arg5[%70] : memref<32x!tpu.dma_semaphore, #tpu.memory_space<semaphore_mem>> -> memref<1x!tpu.dma_semaphore, #tpu.memory_space<semaphore_mem>>
    %74 = tpu.memref_squeeze %73 : memref<1x!tpu.dma_semaphore, #tpu.memory_space<semaphore_mem>> -> memref<!tpu.dma_semaphore, #tpu.memory_space<semaphore_mem>>
    tpu.wait_dma2 semaphore(%74 : memref<!tpu.dma_semaphore, #tpu.memory_space<semaphore_mem>>) src(%71 : memref<1x128xf32, #tpu.memory_space<any>>) dst(%72 : memref<1x128xf32, #tpu.memory_space<vmem>>)
    %c11_i32 = arith.constant 11 : i32
    %75 = arith.addi %8, %c11_i32 : i32
    %c11_i32_50 = arith.constant 11 : i32
    %76 = arith.addi %8, %c11_i32_50 : i32
    %c0_i32_51 = arith.constant 0 : i32
    %c0_i32_52 = arith.constant 0 : i32
    %77 = tpu.memref_slice %arg2[%c0_i32_51, %c0_i32_52] : memref<512x128xf32, #tpu.memory_space<any>> -> memref<1x128xf32, #tpu.memory_space<any>>
    %c0_i32_53 = arith.constant 0 : i32
    %78 = tpu.memref_slice %arg4[%75, %c0_i32_53] : memref<32x128xf32, #tpu.memory_space<vmem>> -> memref<1x128xf32, #tpu.memory_space<vmem>>
    %79 = tpu.memref_slice %arg5[%76] : memref<32x!tpu.dma_semaphore, #tpu.memory_space<semaphore_mem>> -> memref<1x!tpu.dma_semaphore, #tpu.memory_space<semaphore_mem>>
    %80 = tpu.memref_squeeze %79 : memref<1x!tpu.dma_semaphore, #tpu.memory_space<semaphore_mem>> -> memref<!tpu.dma_semaphore, #tpu.memory_space<semaphore_mem>>
    tpu.wait_dma2 semaphore(%80 : memref<!tpu.dma_semaphore, #tpu.memory_space<semaphore_mem>>) src(%77 : memref<1x128xf32, #tpu.memory_space<any>>) dst(%78 : memref<1x128xf32, #tpu.memory_space<vmem>>)
    %c12_i32 = arith.constant 12 : i32
    %81 = arith.addi %8, %c12_i32 : i32
    %c12_i32_54 = arith.constant 12 : i32
    %82 = arith.addi %8, %c12_i32_54 : i32
    %c0_i32_55 = arith.constant 0 : i32
    %c0_i32_56 = arith.constant 0 : i32
    %83 = tpu.memref_slice %arg2[%c0_i32_55, %c0_i32_56] : memref<512x128xf32, #tpu.memory_space<any>> -> memref<1x128xf32, #tpu.memory_space<any>>
    %c0_i32_57 = arith.constant 0 : i32
    %84 = tpu.memref_slice %arg4[%81, %c0_i32_57] : memref<32x128xf32, #tpu.memory_space<vmem>> -> memref<1x128xf32, #tpu.memory_space<vmem>>
    %85 = tpu.memref_slice %arg5[%82] : memref<32x!tpu.dma_semaphore, #tpu.memory_space<semaphore_mem>> -> memref<1x!tpu.dma_semaphore, #tpu.memory_space<semaphore_mem>>
    %86 = tpu.memref_squeeze %85 : memref<1x!tpu.dma_semaphore, #tpu.memory_space<semaphore_mem>> -> memref<!tpu.dma_semaphore, #tpu.memory_space<semaphore_mem>>
    tpu.wait_dma2 semaphore(%86 : memref<!tpu.dma_semaphore, #tpu.memory_space<semaphore_mem>>) src(%83 : memref<1x128xf32, #tpu.memory_space<any>>) dst(%84 : memref<1x128xf32, #tpu.memory_space<vmem>>)
    %c13_i32 = arith.constant 13 : i32
    %87 = arith.addi %8, %c13_i32 : i32
    %c13_i32_58 = arith.constant 13 : i32
    %88 = arith.addi %8, %c13_i32_58 : i32
    %c0_i32_59 = arith.constant 0 : i32
    %c0_i32_60 = arith.constant 0 : i32
    %89 = tpu.memref_slice %arg2[%c0_i32_59, %c0_i32_60] : memref<512x128xf32, #tpu.memory_space<any>> -> memref<1x128xf32, #tpu.memory_space<any>>
    %c0_i32_61 = arith.constant 0 : i32
    %90 = tpu.memref_slice %arg4[%87, %c0_i32_61] : memref<32x128xf32, #tpu.memory_space<vmem>> -> memref<1x128xf32, #tpu.memory_space<vmem>>
    %91 = tpu.memref_slice %arg5[%88] : memref<32x!tpu.dma_semaphore, #tpu.memory_space<semaphore_mem>> -> memref<1x!tpu.dma_semaphore, #tpu.memory_space<semaphore_mem>>
    %92 = tpu.memref_squeeze %91 : memref<1x!tpu.dma_semaphore, #tpu.memory_space<semaphore_mem>> -> memref<!tpu.dma_semaphore, #tpu.memory_space<semaphore_mem>>
    tpu.wait_dma2 semaphore(%92 : memref<!tpu.dma_semaphore, #tpu.memory_space<semaphore_mem>>) src(%89 : memref<1x128xf32, #tpu.memory_space<any>>) dst(%90 : memref<1x128xf32, #tpu.memory_space<vmem>>)
    %c14_i32 = arith.constant 14 : i32
    %93 = arith.addi %8, %c14_i32 : i32
    %c14_i32_62 = arith.constant 14 : i32
    %94 = arith.addi %8, %c14_i32_62 : i32
    %c0_i32_63 = arith.constant 0 : i32
    %c0_i32_64 = arith.constant 0 : i32
    %95 = tpu.memref_slice %arg2[%c0_i32_63, %c0_i32_64] : memref<512x128xf32, #tpu.memory_space<any>> -> memref<1x128xf32, #tpu.memory_space<any>>
    %c0_i32_65 = arith.constant 0 : i32
    %96 = tpu.memref_slice %arg4[%93, %c0_i32_65] : memref<32x128xf32, #tpu.memory_space<vmem>> -> memref<1x128xf32, #tpu.memory_space<vmem>>
    %97 = tpu.memref_slice %arg5[%94] : memref<32x!tpu.dma_semaphore, #tpu.memory_space<semaphore_mem>> -> memref<1x!tpu.dma_semaphore, #tpu.memory_space<semaphore_mem>>
    %98 = tpu.memref_squeeze %97 : memref<1x!tpu.dma_semaphore, #tpu.memory_space<semaphore_mem>> -> memref<!tpu.dma_semaphore, #tpu.memory_space<semaphore_mem>>
    tpu.wait_dma2 semaphore(%98 : memref<!tpu.dma_semaphore, #tpu.memory_space<semaphore_mem>>) src(%95 : memref<1x128xf32, #tpu.memory_space<any>>) dst(%96 : memref<1x128xf32, #tpu.memory_space<vmem>>)
    %c15_i32 = arith.constant 15 : i32
    %99 = arith.addi %8, %c15_i32 : i32
    %c15_i32_66 = arith.constant 15 : i32
    %100 = arith.addi %8, %c15_i32_66 : i32
    %c0_i32_67 = arith.constant 0 : i32
    %c0_i32_68 = arith.constant 0 : i32
    %101 = tpu.memref_slice %arg2[%c0_i32_67, %c0_i32_68] : memref<512x128xf32, #tpu.memory_space<any>> -> memref<1x128xf32, #tpu.memory_space<any>>
    %c0_i32_69 = arith.constant 0 : i32
    %102 = tpu.memref_slice %arg4[%99, %c0_i32_69] : memref<32x128xf32, #tpu.memory_space<vmem>> -> memref<1x128xf32, #tpu.memory_space<vmem>>
    %103 = tpu.memref_slice %arg5[%100] : memref<32x!tpu.dma_semaphore, #tpu.memory_space<semaphore_mem>> -> memref<1x!tpu.dma_semaphore, #tpu.memory_space<semaphore_mem>>
    %104 = tpu.memref_squeeze %103 : memref<1x!tpu.dma_semaphore, #tpu.memory_space<semaphore_mem>> -> memref<!tpu.dma_semaphore, #tpu.memory_space<semaphore_mem>>
    tpu.wait_dma2 semaphore(%104 : memref<!tpu.dma_semaphore, #tpu.memory_space<semaphore_mem>>) src(%101 : memref<1x128xf32, #tpu.memory_space<any>>) dst(%102 : memref<1x128xf32, #tpu.memory_space<vmem>>)
    %c16_i32_70 = arith.constant 16 : i32
    %105 = arith.muli %0, %c16_i32_70 : i32
    %106 = tpu.assume_multiple %105, 16 : i32
    %107 = arith.index_cast %106 : i32 to index
    %c0 = arith.constant 0 : index
    %108 = vector.load %arg4[%107, %c0] : memref<32x128xf32, #tpu.memory_space<vmem>>, vector<16x128xf32>
    %cst = arith.constant 11.3137083 : f32
    %109 = vector.broadcast %cst : f32 to vector<16x128xf32>
    %110 = arith.mulf %108, %109 : vector<16x128xf32>
    %c0_71 = arith.constant 0 : index
    %c0_72 = arith.constant 0 : index
    %111 = vector.load %arg3[%c0_71, %c0_72] : memref<16x128xf32, #tpu.memory_space<vmem>>, vector<16x128xf32>
    tpu.vector_store %arg3[%c0_71, %c0_72], %110 {strides = array<i32>} : memref<16x128xf32, #tpu.memory_space<vmem>>, vector<16x128xf32>,
    return
  }
  func.func @transform_1(%arg0: i32, %arg1: memref<16xi32, #tpu.memory_space<smem>>) -> (i32, i32) {
    %c0_i32 = arith.constant 0 : i32
    %c0_i32_0 = arith.constant 0 : i32
    return %arg0, %c0_i32 : i32, i32
  }
}

</mosaic_0001>

<bundles_post_ra>
// kernel: tpu_custom_call.1
= control target key start
LH: loop header
LB: loop body
LE: loop exit
PB: predicated region body
PF: predicated region fallthrough
CT: control target
= control target key end

     0   :  { %s1614_s9 = smov [#allocation5]   ;;  %s1894_s0 = inlined_call_operand.hbm [shape: s32[16], index: 0, kind: input, shape index: {}]   ;;  %s1895_s1 = inlined_call_operand.hbm [shape: f32[512,128], index: 1, kind: input, shape index: {}]   ;;  %s1896_s2 = inlined_call_operand.hbm [shape: f32[16,128], index: 2, kind: output, shape index: {}]  }
   0x1   :  { %8 = dma.hbm_to_smem %s1894_s0, 16, %s1614_s9, [#allocation4] }
   0x2   :  { %1578 = dma.done.wait [#allocation4], 16 }
   0x3   :  { %1579 = vsyncadd [#allocation4], 4294967280 }
   0x4   :  { %10 = sfence }
   0x5   :  { %11 = vsyncpa [#allocation7], 0  ;;  %s17_s12 = sld [smem:[#allocation5]]  ;;  %s1615_s13 = smov [#allocation2]  }
   0x6   :  { %s27_s14 = sshll.u32 %s1615_s13, 4  ;;  %s1652_s15 = sld [smem:[#allocation5 + $0x1]]  ;;  %s1654_s14 = int_to_ptr.vmem [resolvable:$true] %s27_s14 }
   0x7   :  { %s1616_s16 = smov [#allocation2 + $0x1]   ;;  %s1656_s18 = sld [smem:[#allocation5 + $0x2]] }
   0x8   :  { %s43_s17 = sshll.u32 %s1616_s16, 4  ;;  %s1617_s19 = smov [#allocation2 + $0x2]   ;;  %s1658_s17 = int_to_ptr.vmem [resolvable:$true] %s43_s17 }
   0x9   :  { %s59_s0 = sshll.u32 %s1617_s19, 4  ;;  %s1660_s20 = sld [smem:[#allocation5 + $0x3]]  ;;  %s1662_s0 = int_to_ptr.vmem [resolvable:$true] %s59_s0 }
   0xa   :  { %s1671_s29 = scalar_lea.hbm %s1895_s1, 8192 }
   0xb   :  { %s1083_s21 = sshll.u32 %s17_s12, 4 }
   0xc   :  { %s19_s24 = scalar_lea.hbm %s1895_s1, %s1083_s21  ;;  %s1085_s25 = sshll.u32 %s1652_s15, 4 }
   0xd   :  { %s1206_s26 = scalar_lea.hbm %s19_s24, 16  ;;  %p1209_p1 = scmp.lt.s32.totalorder %s19_s24, %s1895_s1 }
   0xe   :  { %p1207_p0 = scmp.ne.s32.totalorder %s19_s24, %s1206_s26  ;;  %p1210_p2 = scmp.lt.s32.totalorder %s1671_s29, %s1206_s26 }
  0x10   :  { %p1211_p3 = por %p1210_p2, %p1209_p1 }
  0x12   :  { %p1212_p4 = pnand %p1211_p3, %p1207_p0 }
  0x14   :  { %1215 = shalt.err (!%p1212_p4)  }
  0x15   :  { %s1216_s4 = scalar_lea.vmem %s1654_s14, 16  ;;  %s1680_s5 = scalar_lea.vmem %s1654_s14, 512 }
  0x16   :  { %p1217_p5 = scmp.ne.s32.totalorder %s1654_s14, %s1216_s4  ;;  %p1221_p6 = scmp.lt.s32.totalorder %s1654_s14, %s1654_s14 }
  0x17   :  { %p1222_p7 = scmp.lt.s32.totalorder %s1680_s5, %s1216_s4 }
  0x19   :  { %p1223_p8 = por %p1222_p7, %p1221_p6 }
  0x1b   :  { %p1224_p9 = pnand %p1223_p8, %p1217_p5 }
  0x1d   :  { %1227 = shalt.err (!%p1224_p9)  }
  0x1e   :  { %30 = dma.hbm_to_vmem [thread:$0]  %s19_s24, 16, %s1654_s14, [#allocation3] }
  0x1f   :  { %s33_s8 = scalar_lea.hbm %s1895_s1, %s1085_s25  ;;  %s1087_s9 = sshll.u32 %s1656_s18, 4 }
  0x20   :  { %s1228_s10 = scalar_lea.hbm %s33_s8, 16  ;;  %p1231_p11 = scmp.lt.s32.totalorder %s33_s8, %s1895_s1 }
  0x21   :  { %p1229_p10 = scmp.ne.s32.totalorder %s33_s8, %s1228_s10  ;;  %p1232_p12 = scmp.lt.s32.totalorder %s1671_s29, %s1228_s10 }
  0x23   :  { %p1233_p13 = por %p1232_p12, %p1231_p11 }
  0x25   :  { %p1234_p0 = pnand %p1233_p13, %p1229_p10 }
  0x27   :  { %1237 = shalt.err (!%p1234_p0)  }
  0x28   :  { %s1238_s13 = scalar_lea.vmem %s1658_s17, 16  ;;  %p1243_p2 = scmp.lt.s32.totalorder %s1658_s17, %s1654_s14 }
  0x29   :  { %p1239_p1 = scmp.ne.s32.totalorder %s1658_s17, %s1238_s13  ;;  %p1244_p3 = scmp.lt.s32.totalorder %s1680_s5, %s1238_s13 }
  0x2b   :  { %p1245_p4 = por %p1244_p3, %p1243_p2 }
  0x2d   :  { %p1246_p5 = pnand %p1245_p4, %p1239_p1 }
  0x2f   :  { %1249 = shalt.err (!%p1246_p5)  }
  0x30   :  { %46 = dma.hbm_to_vmem [thread:$0]  %s33_s8, 16, %s1658_s17, [#allocation3 + $0x1] }
  0x31   :  { %s49_s18 = scalar_lea.hbm %s1895_s1, %s1087_s9  ;;  %s1089_s19 = sshll.u32 %s1660_s20, 4 }
  0x32   :  { %s1250_s21 = scalar_lea.hbm %s49_s18, 16  ;;  %p1253_p7 = scmp.lt.s32.totalorder %s49_s18, %s1895_s1 }
  0x33   :  { %p1251_p6 = scmp.ne.s32.totalorder %s49_s18, %s1250_s21  ;;  %p1254_p8 = scmp.lt.s32.totalorder %s1671_s29, %s1250_s21 }
  0x35   :  { %p1255_p9 = por %p1254_p8, %p1253_p7 }
  0x37   :  { %p1256_p10 = pnand %p1255_p9, %p1251_p6 }
  0x39   :  { %1259 = shalt.err (!%p1256_p10)  }
  0x3a   :  { %s1260_s17 = scalar_lea.vmem %s1662_s0, 16  ;;  %p1265_p12 = scmp.lt.s32.totalorder %s1662_s0, %s1654_s14 }
  0x3b   :  { %p1261_p11 = scmp.ne.s32.totalorder %s1662_s0, %s1260_s17  ;;  %p1266_p13 = scmp.lt.s32.totalorder %s1680_s5, %s1260_s17 }
  0x3d   :  { %p1267_p0 = por %p1266_p13, %p1265_p12 }
  0x3f   :  { %p1268_p1 = pnand %p1267_p0, %p1261_p11 }
  0x41   :  { %1271 = shalt.err (!%p1268_p1)  }
  0x42   :  { %62 = dma.hbm_to_vmem [thread:$0]  %s49_s18, 16, %s1662_s0, [#allocation3 + $0x2] }
  0x43   :  { %s65_s25 = scalar_lea.hbm %s1895_s1, %s1089_s19  ;;  %s1618_s26 = smov [#allocation2 + $0x3]  }
  0x44   :  { %s75_s27 = sshll.u32 %s1618_s26, 4  ;;  %s1090_s28 = sld [smem:[#allocation5 + $0x4]]  ;;  %s76_s27 = int_to_ptr.vmem [resolvable:$true] %s75_s27 }
  0x45   :  { %s1272_s30 = scalar_lea.hbm %s65_s25, 16  ;;  %p1275_p3 = scmp.lt.s32.totalorder %s65_s25, %s1895_s1 }
  0x46   :  { %p1273_p2 = scmp.ne.s32.totalorder %s65_s25, %s1272_s30  ;;  %p1276_p4 = scmp.lt.s32.totalorder %s1671_s29, %s1272_s30 }
  0x48   :  { %p1277_p5 = por %p1276_p4, %p1275_p3 }
  0x4a   :  { %p1278_p6 = pnand %p1277_p5, %p1273_p2 }
  0x4c   :  { %1281 = shalt.err (!%p1278_p6)  }
  0x4d   :  { %s1282_s6 = scalar_lea.vmem %s76_s27, 16  ;;  %p1287_p8 = scmp.lt.s32.totalorder %s76_s27, %s1654_s14 }
  0x4e   :  { %p1283_p7 = scmp.ne.s32.totalorder %s76_s27, %s1282_s6  ;;  %p1288_p9 = scmp.lt.s32.totalorder %s1680_s5, %s1282_s6 }
  0x50   :  { %p1289_p10 = por %p1288_p9, %p1287_p8 }
  0x52   :  { %p1290_p11 = pnand %p1289_p10, %p1283_p7 }
  0x54   :  { %1293 = shalt.err (!%p1290_p11)  }
  0x55   :  { %78 = dma.hbm_to_vmem [thread:$0]  %s65_s25, 16, %s76_s27, [#allocation3 + $0x3] }
  0x56   :  { %s1619_s0 = smov [#allocation2 + $0x4]   ;;  %s1092_s8 = sld [smem:[#allocation5 + $0x5]] }
  0x57   :  { %s91_s7 = sshll.u32 %s1619_s0, 4  ;;  %s1620_s9 = smov [#allocation2 + $0x5]   ;;  %s92_s7 = int_to_ptr.vmem [resolvable:$true] %s91_s7 }
  0x58   :  { %s107_s10 = sshll.u32 %s1620_s9, 4  ;;  %s1723_s11 = sld [smem:[#allocation5 + $0x6]]  ;;  %s1725_s10 = int_to_ptr.vmem [resolvable:$true] %s107_s10 }
  0x59   :  { %s1091_s12 = sshll.u32 %s1090_s28, 4 }
  0x5a   :  { %s81_s16 = scalar_lea.hbm %s1895_s1, %s1091_s12 }
  0x5b   :  { %s1294_s18 = scalar_lea.hbm %s81_s16, 16  ;;  %p1297_p13 = scmp.lt.s32.totalorder %s81_s16, %s1895_s1 }
  0x5c   :  { %p1295_p12 = scmp.ne.s32.totalorder %s81_s16, %s1294_s18  ;;  %p1298_p0 = scmp.lt.s32.totalorder %s1671_s29, %s1294_s18 }
  0x5e   :  { %p1299_p1 = por %p1298_p0, %p1297_p13 }
  0x60   :  { %p1300_p2 = pnand %p1299_p1, %p1295_p12 }
  0x62   :  { %1303 = shalt.err (!%p1300_p2)  }
  0x63   :  { %s1304_s22 = scalar_lea.vmem %s92_s7, 16  ;;  %p1309_p4 = scmp.lt.s32.totalorder %s92_s7, %s1654_s14 }
  0x64   :  { %p1305_p3 = scmp.ne.s32.totalorder %s92_s7, %s1304_s22  ;;  %p1310_p5 = scmp.lt.s32.totalorder %s1680_s5, %s1304_s22 }
  0x66   :  { %p1311_p6 = por %p1310_p5, %p1309_p4 }
  0x68   :  { %p1312_p7 = pnand %p1311_p6, %p1305_p3 }
  0x6a   :  { %1315 = shalt.err (!%p1312_p7)  }
  0x6b   :  { %94 = dma.hbm_to_vmem [thread:$0]  %s81_s16, 16, %s92_s7, [#allocation3 + $0x4] }
  0x6c   :  { %s1093_s23 = sshll.u32 %s1092_s8, 4  ;;  %s1621_s17 = smov [#allocation2 + $0x6]  }
  0x6d   :  { %s123_s20 = sshll.u32 %s1621_s17, 4  ;;  %s97_s26 = scalar_lea.hbm %s1895_s1, %s1093_s23  ;;  %s1739_s20 = int_to_ptr.vmem [resolvable:$true] %s123_s20 }
  0x6e   :  { %s1316_s27 = scalar_lea.hbm %s97_s26, 16  ;;  %p1319_p9 = scmp.lt.s32.totalorder %s97_s26, %s1895_s1 }
  0x6f   :  { %p1317_p8 = scmp.ne.s32.totalorder %s97_s26, %s1316_s27  ;;  %p1320_p10 = scmp.lt.s32.totalorder %s1671_s29, %s1316_s27 }
  0x71   :  { %p1321_p11 = por %p1320_p10, %p1319_p9 }
  0x73   :  { %p1322_p12 = pnand %p1321_p11, %p1317_p8 }
  0x75   :  { %1325 = shalt.err (!%p1322_p12)  }
  0x76   :  { %s1326_s3 = scalar_lea.vmem %s1725_s10, 16  ;;  %p1331_p0 = scmp.lt.s32.totalorder %s1725_s10, %s1654_s14 }
  0x77   :  { %p1327_p13 = scmp.ne.s32.totalorder %s1725_s10, %s1326_s3  ;;  %p1332_p1 = scmp.lt.s32.totalorder %s1680_s5, %s1326_s3 }
  0x79   :  { %p1333_p2 = por %p1332_p1, %p1331_p0 }
  0x7b   :  { %p1334_p3 = pnand %p1333_p2, %p1327_p13 }
  0x7d   :  { %1337 = shalt.err (!%p1334_p3)  }
  0x7e   :  { %110 = dma.hbm_to_vmem [thread:$0]  %s97_s26, 16, %s1725_s10, [#allocation3 + $0x5] }
  0x7f   :  { %s1095_s4 = sshll.u32 %s1723_s11, 4  ;;  %s1096_s6 = sld [smem:[#allocation5 + $0x7]] }
  0x80   :  { %s113_s8 = scalar_lea.hbm %s1895_s1, %s1095_s4 }
  0x81   :  { %s1338_s9 = scalar_lea.hbm %s113_s8, 16  ;;  %p1341_p5 = scmp.lt.s32.totalorder %s113_s8, %s1895_s1 }
  0x82   :  { %p1339_p4 = scmp.ne.s32.totalorder %s113_s8, %s1338_s9  ;;  %p1342_p6 = scmp.lt.s32.totalorder %s1671_s29, %s1338_s9 }
  0x84   :  { %p1343_p7 = por %p1342_p6, %p1341_p5 }
  0x86   :  { %p1344_p8 = pnand %p1343_p7, %p1339_p4 }
  0x88   :  { %1347 = shalt.err (!%p1344_p8)  }
  0x89   :  { %s1348_s10 = scalar_lea.vmem %s1739_s20, 16  ;;  %p1353_p10 = scmp.lt.s32.totalorder %s1739_s20, %s1654_s14 }
  0x8a   :  { %p1349_p9 = scmp.ne.s32.totalorder %s1739_s20, %s1348_s10  ;;  %p1354_p11 = scmp.lt.s32.totalorder %s1680_s5, %s1348_s10 }
  0x8c   :  { %p1355_p12 = por %p1354_p11, %p1353_p10 }
  0x8e   :  { %p1356_p13 = pnand %p1355_p12, %p1349_p9 }
  0x90   :  { %1359 = shalt.err (!%p1356_p13)  }
  0x91   :  { %126 = dma.hbm_to_vmem [thread:$0]  %s113_s8, 16, %s1739_s20, [#allocation3 + $0x6] }
  0x92   :  { %s1622_s11 = smov [#allocation2 + $0x7]   ;;  %s1098_s16 = sld [smem:[#allocation5 + $0x8]] }
  0x93   :  { %s139_s15 = sshll.u32 %s1622_s11, 4  ;;  %s1623_s18 = smov [#allocation2 + $0x8]   ;;  %s140_s15 = int_to_ptr.vmem [resolvable:$true] %s139_s15 }
  0x94   :  { %s155_s19 = sshll.u32 %s1623_s18, 4  ;;  %s1765_s21 = sld [smem:[#allocation5 + $0x9]]  ;;  %s1767_s19 = int_to_ptr.vmem [resolvable:$true] %s155_s19 }
  0x95   :  { %s1097_s22 = sshll.u32 %s1096_s6, 4 }
  0x96   :  { %s129_s24 = scalar_lea.hbm %s1895_s1, %s1097_s22 }
  0x97   :  { %s1360_s25 = scalar_lea.hbm %s129_s24, 16  ;;  %p1363_p1 = scmp.lt.s32.totalorder %s129_s24, %s1895_s1 }
  0x98   :  { %p1361_p0 = scmp.ne.s32.totalorder %s129_s24, %s1360_s25  ;;  %p1364_p2 = scmp.lt.s32.totalorder %s1671_s29, %s1360_s25 }
  0x9a   :  { %p1365_p3 = por %p1364_p2, %p1363_p1 }
  0x9c   :  { %p1366_p4 = pnand %p1365_p3, %p1361_p0 }
  0x9e   :  { %1369 = shalt.err (!%p1366_p4)  }
  0x9f   :  { %s1370_s20 = scalar_lea.vmem %s140_s15, 16  ;;  %p1375_p6 = scmp.lt.s32.totalorder %s140_s15, %s1654_s14 }
  0xa0   :  { %p1371_p5 = scmp.ne.s32.totalorder %s140_s15, %s1370_s20  ;;  %p1376_p7 = scmp.lt.s32.totalorder %s1680_s5, %s1370_s20 }
  0xa2   :  { %p1377_p8 = por %p1376_p7, %p1375_p6 }
  0xa4   :  { %p1378_p9 = pnand %p1377_p8, %p1371_p5 }
  0xa6   :  { %1381 = shalt.err (!%p1378_p9)  }
  0xa7   :  { %142 = dma.hbm_to_vmem [thread:$0]  %s129_s24, 16, %s140_s15, [#allocation3 + $0x7] }
  0xa8   :  { %s1099_s28 = sshll.u32 %s1098_s16, 4  ;;  %s1624_s30 = smov [#allocation2 + $0x9]  }
  0xa9   :  { %s171_s3 = sshll.u32 %s1624_s30, 4  ;;  %s145_s0 = scalar_lea.hbm %s1895_s1, %s1099_s28  ;;  %s1781_s3 = int_to_ptr.vmem [resolvable:$true] %s171_s3 }
  0xaa   :  { %s1382_s7 = scalar_lea.hbm %s145_s0, 16  ;;  %p1385_p11 = scmp.lt.s32.totalorder %s145_s0, %s1895_s1 }
  0xab   :  { %p1383_p10 = scmp.ne.s32.totalorder %s145_s0, %s1382_s7  ;;  %p1386_p12 = scmp.lt.s32.totalorder %s1671_s29, %s1382_s7 }
  0xad   :  { %p1387_p13 = por %p1386_p12, %p1385_p11 }
  0xaf   :  { %p1388_p0 = pnand %p1387_p13, %p1383_p10 }
  0xb1   :  { %1391 = shalt.err (!%p1388_p0)  }
  0xb2   :  { %s1392_s12 = scalar_lea.vmem %s1767_s19, 16  ;;  %p1397_p2 = scmp.lt.s32.totalorder %s1767_s19, %s1654_s14 }
  0xb3   :  { %p1393_p1 = scmp.ne.s32.totalorder %s1767_s19, %s1392_s12  ;;  %p1398_p3 = scmp.lt.s32.totalorder %s1680_s5, %s1392_s12 }
  0xb5   :  { %p1399_p4 = por %p1398_p3, %p1397_p2 }
  0xb7   :  { %p1400_p5 = pnand %p1399_p4, %p1393_p1 }
  0xb9   :  { %1403 = shalt.err (!%p1400_p5)  }
  0xba   :  { %158 = dma.hbm_to_vmem [thread:$0]  %s145_s0, 16, %s1767_s19, [#allocation3 + $0x8] }
  0xbb   :  { %s1101_s13 = sshll.u32 %s1765_s21, 4  ;;  %s1102_s10 = sld [smem:[#allocation5 + $0xa]] }
  0xbc   :  { %s161_s16 = scalar_lea.hbm %s1895_s1, %s1101_s13 }
  0xbd   :  { %s1404_s18 = scalar_lea.hbm %s161_s16, 16  ;;  %p1407_p7 = scmp.lt.s32.totalorder %s161_s16, %s1895_s1 }
  0xbe   :  { %p1405_p6 = scmp.ne.s32.totalorder %s161_s16, %s1404_s18  ;;  %p1408_p8 = scmp.lt.s32.totalorder %s1671_s29, %s1404_s18 }
  0xc0   :  { %p1409_p9 = por %p1408_p8, %p1407_p7 }
  0xc2   :  { %p1410_p10 = pnand %p1409_p9, %p1405_p6 }
  0xc4   :  { %1413 = shalt.err (!%p1410_p10)  }
  0xc5   :  { %s1414_s19 = scalar_lea.vmem %s1781_s3, 16  ;;  %p1419_p12 = scmp.lt.s32.totalorder %s1781_s3, %s1654_s14 }
  0xc6   :  { %p1415_p11 = scmp.ne.s32.totalorder %s1781_s3, %s1414_s19  ;;  %p1420_p13 = scmp.lt.s32.totalorder %s1680_s5, %s1414_s19 }
  0xc8   :  { %p1421_p0 = por %p1420_p13, %p1419_p12 }
  0xca   :  { %p1422_p1 = pnand %p1421_p0, %p1415_p11 }
  0xcc   :  { %1425 = shalt.err (!%p1422_p1)  }
  0xcd   :  { %174 = dma.hbm_to_vmem [thread:$0]  %s161_s16, 16, %s1781_s3, [#allocation3 + $0x9] }
  0xce   :  { %s1625_s21 = smov [#allocation2 + $0xa]   ;;  %s1104_s24 = sld [smem:[#allocation5 + $0xb]] }
  0xcf   :  { %s187_s17 = sshll.u32 %s1625_s21, 4  ;;  %s1626_s25 = smov [#allocation2 + $0xb]   ;;  %s188_s17 = int_to_ptr.vmem [resolvable:$true] %s187_s17 }
  0xd0   :  { %s203_s26 = sshll.u32 %s1626_s25, 4  ;;  %s1807_s27 = sld [smem:[#allocation5 + $0xc]]  ;;  %s1809_s26 = int_to_ptr.vmem [resolvable:$true] %s203_s26 }
  0xd1   :  { %s1103_s20 = sshll.u32 %s1102_s10, 4 }
  0xd2   :  { %s177_s4 = scalar_lea.hbm %s1895_s1, %s1103_s20 }
  0xd3   :  { %s1426_s6 = scalar_lea.hbm %s177_s4, 16  ;;  %p1429_p3 = scmp.lt.s32.totalorder %s177_s4, %s1895_s1 }
  0xd4   :  { %p1427_p2 = scmp.ne.s32.totalorder %s177_s4, %s1426_s6  ;;  %p1430_p4 = scmp.lt.s32.totalorder %s1671_s29, %s1426_s6 }
  0xd6   :  { %p1431_p5 = por %p1430_p4, %p1429_p3 }
  0xd8   :  { %p1432_p6 = pnand %p1431_p5, %p1427_p2 }
  0xda   :  { %1435 = shalt.err (!%p1432_p6)  }
  0xdb   :  { %s1436_s3 = scalar_lea.vmem %s188_s17, 16  ;;  %p1441_p8 = scmp.lt.s32.totalorder %s188_s17, %s1654_s14 }
  0xdc   :  { %p1437_p7 = scmp.ne.s32.totalorder %s188_s17, %s1436_s3  ;;  %p1442_p9 = scmp.lt.s32.totalorder %s1680_s5, %s1436_s3 }
  0xde   :  { %p1443_p10 = por %p1442_p9, %p1441_p8 }
  0xe0   :  { %p1444_p11 = pnand %p1443_p10, %p1437_p7 }
  0xe2   :  { %1447 = shalt.err (!%p1444_p11)  }
  0xe3   :  { %190 = dma.hbm_to_vmem [thread:$0]  %s177_s4, 16, %s188_s17, [#allocation3 + $0xa] }
  0xe4   :  { %s1105_s8 = sshll.u32 %s1104_s24, 4  ;;  %s1627_s9 = smov [#allocation2 + $0xc]  }
  0xe5   :  { %s219_s12 = sshll.u32 %s1627_s9, 4  ;;  %s193_s11 = scalar_lea.hbm %s1895_s1, %s1105_s8  ;;  %s1823_s12 = int_to_ptr.vmem [resolvable:$true] %s219_s12 }
  0xe6   :  { %s1448_s15 = scalar_lea.hbm %s193_s11, 16  ;;  %p1451_p13 = scmp.lt.s32.totalorder %s193_s11, %s1895_s1 }
  0xe7   :  { %p1449_p12 = scmp.ne.s32.totalorder %s193_s11, %s1448_s15  ;;  %p1452_p0 = scmp.lt.s32.totalorder %s1671_s29, %s1448_s15 }
  0xe9   :  { %p1453_p1 = por %p1452_p0, %p1451_p13 }
  0xeb   :  { %p1454_p2 = pnand %p1453_p1, %p1449_p12 }
  0xed   :  { %1457 = shalt.err (!%p1454_p2)  }
  0xee   :  { %s1458_s22 = scalar_lea.vmem %s1809_s26, 16  ;;  %p1463_p4 = scmp.lt.s32.totalorder %s1809_s26, %s1654_s14 }
  0xef   :  { %p1459_p3 = scmp.ne.s32.totalorder %s1809_s26, %s1458_s22  ;;  %p1464_p5 = scmp.lt.s32.totalorder %s1680_s5, %s1458_s22 }
  0xf1   :  { %p1465_p6 = por %p1464_p5, %p1463_p4 }
  0xf3   :  { %p1466_p7 = pnand %p1465_p6, %p1459_p3 }
  0xf5   :  { %1469 = shalt.err (!%p1466_p7)  }
  0xf6   :  { %206 = dma.hbm_to_vmem [thread:$0]  %s193_s11, 16, %s1809_s26, [#allocation3 + $0xb] }
  0xf7   :  { %s1107_s23 = sshll.u32 %s1807_s27, 4  ;;  %s1108_s19 = sld [smem:[#allocation5 + $0xd]] }
  0xf8   :  { %s209_s24 = scalar_lea.hbm %s1895_s1, %s1107_s23 }
  0xf9   :  { %s1470_s25 = scalar_lea.hbm %s209_s24, 16  ;;  %p1473_p9 = scmp.lt.s32.totalorder %s209_s24, %s1895_s1 }
  0xfa   :  { %p1471_p8 = scmp.ne.s32.totalorder %s209_s24, %s1470_s25  ;;  %p1474_p10 = scmp.lt.s32.totalorder %s1671_s29, %s1470_s25 }
  0xfc   :  { %p1475_p11 = por %p1474_p10, %p1473_p9 }
  0xfe   :  { %p1476_p12 = pnand %p1475_p11, %p1471_p8 }
 0x100   :  { %1479 = shalt.err (!%p1476_p12)  }
 0x101   :  { %s1480_s26 = scalar_lea.vmem %s1823_s12, 16  ;;  %p1485_p0 = scmp.lt.s32.totalorder %s1823_s12, %s1654_s14 }
 0x102   :  { %p1481_p13 = scmp.ne.s32.totalorder %s1823_s12, %s1480_s26  ;;  %p1486_p1 = scmp.lt.s32.totalorder %s1680_s5, %s1480_s26 }
 0x104   :  { %p1487_p2 = por %p1486_p1, %p1485_p0 }
 0x106   :  { %p1488_p3 = pnand %p1487_p2, %p1481_p13 }
 0x108   :  { %1491 = shalt.err (!%p1488_p3)  }
 0x109   :  { %222 = dma.hbm_to_vmem [thread:$0]  %s209_s24, 16, %s1823_s12, [#allocation3 + $0xc] }
 0x10a   :  { %s1628_s27 = smov [#allocation2 + $0xd]   ;;  %s1110_s4 = sld [smem:[#allocation5 + $0xe]] }
 0x10b   :  { %s235_s30 = sshll.u32 %s1628_s27, 4  ;;  %s1629_s6 = smov [#allocation2 + $0xe]   ;;  %s236_s30 = int_to_ptr.vmem [resolvable:$true] %s235_s30 }
 0x10c   :  { %s251_s0 = sshll.u32 %s1629_s6, 4  ;;  %s1849_s7 = sld [smem:[#allocation5 + $0xf]]  ;;  %s1851_s0 = int_to_ptr.vmem [resolvable:$true] %s251_s0 }
 0x10d   :  { %s1109_s3 = sshll.u32 %s1108_s19, 4 }
 0x10e   :  { %s225_s13 = scalar_lea.hbm %s1895_s1, %s1109_s3 }
 0x10f   :  { %s1492_s10 = scalar_lea.hbm %s225_s13, 16  ;;  %p1495_p5 = scmp.lt.s32.totalorder %s225_s13, %s1895_s1 }
 0x110   :  { %p1493_p4 = scmp.ne.s32.totalorder %s225_s13, %s1492_s10  ;;  %p1496_p6 = scmp.lt.s32.totalorder %s1671_s29, %s1492_s10 }
 0x112   :  { %p1497_p7 = por %p1496_p6, %p1495_p5 }
 0x114   :  { %p1498_p8 = pnand %p1497_p7, %p1493_p4 }
 0x116   :  { %1501 = shalt.err (!%p1498_p8)  }
 0x117   :  { %s1502_s12 = scalar_lea.vmem %s236_s30, 16  ;;  %p1507_p10 = scmp.lt.s32.totalorder %s236_s30, %s1654_s14 }
 0x118   :  { %p1503_p9 = scmp.ne.s32.totalorder %s236_s30, %s1502_s12  ;;  %p1508_p11 = scmp.lt.s32.totalorder %s1680_s5, %s1502_s12 }
 0x11a   :  { %p1509_p12 = por %p1508_p11, %p1507_p10 }
 0x11c   :  { %p1510_p13 = pnand %p1509_p12, %p1503_p9 }
 0x11e   :  { %1513 = shalt.err (!%p1510_p13)  }
 0x11f   :  { %238 = dma.hbm_to_vmem [thread:$0]  %s225_s13, 16, %s236_s30, [#allocation3 + $0xd] }
 0x120   :  { %s1111_s16 = sshll.u32 %s1110_s4, 4  ;;  %s1630_s18 = smov [#allocation2 + $0xf]  }
 0x121   :  { %s267_s22 = sshll.u32 %s1630_s18, 4  ;;  %s241_s21 = scalar_lea.hbm %s1895_s1, %s1111_s16  ;;  %s1865_s22 = int_to_ptr.vmem [resolvable:$true] %s267_s22 }
 0x122   :  { %s1514_s17 = scalar_lea.hbm %s241_s21, 16  ;;  %p1517_p1 = scmp.lt.s32.totalorder %s241_s21, %s1895_s1 }
 0x123   :  { %p1515_p0 = scmp.ne.s32.totalorder %s241_s21, %s1514_s17  ;;  %p1518_p2 = scmp.lt.s32.totalorder %s1671_s29, %s1514_s17 }
 0x125   :  { %p1519_p3 = por %p1518_p2, %p1517_p1 }
 0x127   :  { %p1520_p4 = pnand %p1519_p3, %p1515_p0 }
 0x129   :  { %1523 = shalt.err (!%p1520_p4)  }
 0x12a   :  { %s1524_s20 = scalar_lea.vmem %s1851_s0, 16  ;;  %p1529_p6 = scmp.lt.s32.totalorder %s1851_s0, %s1654_s14 }
 0x12b   :  { %p1525_p5 = scmp.ne.s32.totalorder %s1851_s0, %s1524_s20  ;;  %p1530_p7 = scmp.lt.s32.totalorder %s1680_s5, %s1524_s20 }
 0x12d   :  { %p1531_p8 = por %p1530_p7, %p1529_p6 }
 0x12f   :  { %p1532_p9 = pnand %p1531_p8, %p1525_p5 }
 0x131   :  { %1535 = shalt.err (!%p1532_p9)  }
 0x132   :  { %254 = dma.hbm_to_vmem [thread:$0]  %s241_s21, 16, %s1851_s0, [#allocation3 + $0xe] }
 0x133   :  { %s1113_s28 = sshll.u32 %s1849_s7, 4 }
 0x134   :  { %s257_s30 = scalar_lea.hbm %s1895_s1, %s1113_s28 }
 0x135   :  { %s1536_s4 = scalar_lea.hbm %s257_s30, 16  ;;  %p1539_p11 = scmp.lt.s32.totalorder %s257_s30, %s1895_s1 }
 0x136   :  { %p1537_p10 = scmp.ne.s32.totalorder %s257_s30, %s1536_s4  ;;  %p1540_p12 = scmp.lt.s32.totalorder %s1671_s29, %s1536_s4 }
 0x138   :  { %p1541_p13 = por %p1540_p12, %p1539_p11 }
 0x13a   :  { %p1542_p0 = pnand %p1541_p13, %p1537_p10 }
 0x13c   :  { %1545 = shalt.err (!%p1542_p0)  }
 0x13d   :  { %s1546_s0 = scalar_lea.vmem %s1865_s22, 16  ;;  %p1551_p2 = scmp.lt.s32.totalorder %s1865_s22, %s1654_s14 }
 0x13e   :  { %p1547_p1 = scmp.ne.s32.totalorder %s1865_s22, %s1546_s0  ;;  %p1552_p3 = scmp.lt.s32.totalorder %s1680_s5, %s1546_s0 }
 0x140   :  { %p1553_p4 = por %p1552_p3, %p1551_p2 }
 0x142   :  { %p1554_p5 = pnand %p1553_p4, %p1547_p1 }
 0x144   :  { %1557 = shalt.err (!%p1554_p5)  }
 0x145   :  { %270 = dma.hbm_to_vmem [thread:$0]  %s257_s30, 16, %s1865_s22, [#allocation3 + $0xf] }
 0x146   :  { %1580 = dma.done.wait [#allocation3], 16 }
 0x147   :  { %1581 = vsyncadd [#allocation3], 4294967280 }
 0x148   :  { %1582 = dma.done.wait [#allocation3 + $0x1], 16 }
 0x149   :  { %1583 = vsyncadd [#allocation3 + $0x1], 4294967280 }
 0x14a   :  { %1584 = dma.done.wait [#allocation3 + $0x2], 16 }
 0x14b   :  { %1585 = vsyncadd [#allocation3 + $0x2], 4294967280 }
 0x14c   :  { %1586 = dma.done.wait [#allocation3 + $0x3], 16 }
 0x14d   :  { %1587 = vsyncadd [#allocation3 + $0x3], 4294967280 }
 0x14e   :  { %1588 = dma.done.wait [#allocation3 + $0x4], 16 }
 0x14f   :  { %1589 = vsyncadd [#allocation3 + $0x4], 4294967280 }
 0x150   :  { %1590 = dma.done.wait [#allocation3 + $0x5], 16 }
 0x151   :  { %1591 = vsyncadd [#allocation3 + $0x5], 4294967280 }
 0x152   :  { %1592 = dma.done.wait [#allocation3 + $0x6], 16 }
 0x153   :  { %1593 = vsyncadd [#allocation3 + $0x6], 4294967280 }
 0x154   :  { %1594 = dma.done.wait [#allocation3 + $0x7], 16 }
 0x155   :  { %1595 = vsyncadd [#allocation3 + $0x7], 4294967280 }
 0x156   :  { %1596 = dma.done.wait [#allocation3 + $0x8], 16 }
 0x157   :  { %1597 = vsyncadd [#allocation3 + $0x8], 4294967280 }
 0x158   :  { %1598 = dma.done.wait [#allocation3 + $0x9], 16 }
 0x159   :  { %1599 = vsyncadd [#allocation3 + $0x9], 4294967280 }
 0x15a   :  { %1600 = dma.done.wait [#allocation3 + $0xa], 16 }
 0x15b   :  { %1601 = vsyncadd [#allocation3 + $0xa], 4294967280 }
 0x15c   :  { %1602 = dma.done.wait [#allocation3 + $0xb], 16 }
 0x15d   :  { %1603 = vsyncadd [#allocation3 + $0xb], 4294967280 }
 0x15e   :  { %1604 = dma.done.wait [#allocation3 + $0xc], 16 }
 0x15f   :  { %1605 = vsyncadd [#allocation3 + $0xc], 4294967280 }
 0x160   :  { %1606 = dma.done.wait [#allocation3 + $0xd], 16 }
 0x161   :  { %1607 = vsyncadd [#allocation3 + $0xd], 4294967280 }
 0x162   :  { %1608 = dma.done.wait [#allocation3 + $0xe], 16 }
 0x163   :  { %1609 = vsyncadd [#allocation3 + $0xe], 4294967280 }
 0x164   :  { %1610 = dma.done.wait [#allocation3 + $0xf], 16 }
 0x165   :  { %1611 = vsyncadd [#allocation3 + $0xf], 4294967280  ;;  %s1631_s1 = smov [#allocation6]   ;;  %v631_v0 = vld [vmem:[#allocation2] sm:$0xff]  ;;  %v632_v1 = vld [vmem:[#allocation2 + $0x8] sm:$0xff] }
 0x166   :  { %s642_s14 = sshll.u32 %s1631_s1, 4  ;;  %v633_v2 = vmul.f32 11.313708, %v631_v0  ;;  %v634_v3 = vmul.f32 11.313708, %v632_v1  ;;  %s643_s14 = int_to_ptr.vmem [resolvable:$true] %s642_s14 }
 0x167   :  { %s1558_s29 = scalar_lea.vmem %s643_s14, 256  ;;  %p1563_p7 = scmp.lt.s32.totalorder %s643_s14, %s643_s14 }
 0x168   :  { %635 = vst [vmem:[#allocation6] sm:$0xff] %v633_v2  ;;  %636 = vst [vmem:[#allocation6 + $0x8] sm:$0xff] %v634_v3  ;;  %p1559_p6 = scmp.ne.s32.totalorder %s643_s14, %s1558_s29  ;;  %p1564_p8 = scmp.lt.s32.totalorder %s1558_s29, %s1558_s29 }
 0x16a   :  { %p1565_p9 = por %p1564_p8, %p1563_p7 }
 0x16c   :  { %p1566_p10 = pnand %p1565_p9, %p1559_p6 }
 0x16e   :  { %1569 = shalt.err (!%p1566_p10)
}
 0x16f   :  { %s1632_s5 = smov 128   ;;  %s1633_s7 = smov 8  }
 0x170   :  { %648 = dma.vmem_to_hbm [thread:$0]  %s643_s14, 256, %s1896_s2, [#allocation7], %s1632_s5, %s1632_s5, %s1633_s7  }
 0x171   :  { %1612 = dma.done.wait [#allocation7], 256  }
 0x172   :  { %1613 = vsyncadd [#allocation7], 4294967040 }
 0x173   :  { %652 = vsyncpa [#allocation7], 1 }
 0x174   :  { %653 = vsyncmov [#allocation3] }
 0x177   :  { %s654_s13 = vpop.sfrf %653 }
 0x178   :  { %p1146_p11 = scmp.ne.s32.totalorder %s654_s13, 0 }
 0x17a   :  { %658 = shalt.err (%p1146_p11)  }
 0x17b   :  { %660 = vsyncmov [#allocation3 + $0x1] }
 0x17e   :  { %s661_s10 = vpop.sfrf %660 }
 0x17f   :  { %p1147_p12 = scmp.ne.s32.totalorder %s661_s10, 0 }
 0x181   :  { %665 = shalt.err (%p1147_p12)  }
 0x182   :  { %667 = vsyncmov [#allocation3 + $0x2] }
 0x185   :  { %s668_s11 = vpop.sfrf %667 }
 0x186   :  { %p1148_p13 = scmp.ne.s32.totalorder %s668_s11, 0 }
 0x188   :  { %672 = shalt.err (%p1148_p13)  }
 0x189   :  { %674 = vsyncmov [#allocation3 + $0x3] }
 0x18c   :  { %s675_s15 = vpop.sfrf %674 }
 0x18d   :  { %p1149_p0 = scmp.ne.s32.totalorder %s675_s15, 0 }
 0x18f   :  { %679 = shalt.err (%p1149_p0)  }
 0x190   :  { %681 = vsyncmov [#allocation3 + $0x4] }
 0x193   :  { %s682_s2 = vpop.sfrf %681 }
 0x194   :  { %p1150_p1 = scmp.ne.s32.totalorder %s682_s2, 0 }
 0x196   :  { %686 = shalt.err (%p1150_p1)  }
 0x197   :  { %688 = vsyncmov [#allocation3 + $0x5] }
 0x19a   :  { %s689_s12 = vpop.sfrf %688 }
 0x19b   :  { %p1151_p2 = scmp.ne.s32.totalorder %s689_s12, 0 }
 0x19d   :  { %693 = shalt.err (%p1151_p2)  }
 0x19e   :  { %695 = vsyncmov [#allocation3 + $0x6] }
 0x1a1   :  { %s696_s16 = vpop.sfrf %695 }
 0x1a2   :  { %p1152_p3 = scmp.ne.s32.totalorder %s696_s16, 0 }
 0x1a4   :  { %700 = shalt.err (%p1152_p3)  }
 0x1a5   :  { %702 = vsyncmov [#allocation3 + $0x7] }
 0x1a8   :  { %s703_s18 = vpop.sfrf %702 }
 0x1a9   :  { %p1153_p4 = scmp.ne.s32.totalorder %s703_s18, 0 }
 0x1ab   :  { %707 = shalt.err (%p1153_p4)  }
 0x1ac   :  { %709 = vsyncmov [#allocation3 + $0x8] }
 0x1af   :  { %s710_s22 = vpop.sfrf %709 }
 0x1b0   :  { %p1154_p5 = scmp.ne.s32.totalorder %s710_s22, 0 }
 0x1b2   :  { %714 = shalt.err (%p1154_p5)  }
 0x1b3   :  { %716 = vsyncmov [#allocation3 + $0x9] }
 0x1b6   :  { %s717_s23 = vpop.sfrf %716 }
 0x1b7   :  { %p1155_p6 = scmp.ne.s32.totalorder %s717_s23, 0 }
 0x1b9   :  { %721 = shalt.err (%p1155_p6)  }
 0x1ba   :  { %723 = vsyncmov [#allocation3 + $0xa] }
 0x1bd   :  { %s724_s19 = vpop.sfrf %723 }
 0x1be   :  { %p1156_p7 = scmp.ne.s32.totalorder %s724_s19, 0 }
 0x1c0   :  { %728 = shalt.err (%p1156_p7)  }
 0x1c1   :  { %730 = vsyncmov [#allocation3 + $0xb] }
 0x1c4   :  { %s731_s21 = vpop.sfrf %730 }
 0x1c5   :  { %p1157_p8 = scmp.ne.s32.totalorder %s731_s21, 0 }
 0x1c7   :  { %735 = shalt.err (%p1157_p8)  }
 0x1c8   :  { %737 = vsyncmov [#allocation3 + $0xc] }
 0x1cb   :  { %s738_s17 = vpop.sfrf %737 }
 0x1cc   :  { %p1158_p9 = scmp.ne.s32.totalorder %s738_s17, 0 }
 0x1ce   :  { %742 = shalt.err (%p1158_p9)  }
 0x1cf   :  { %744 = vsyncmov [#allocation3 + $0xd] }
 0x1d2   :  { %s745_s24 = vpop.sfrf %744 }
 0x1d3   :  { %p1159_p10 = scmp.ne.s32.totalorder %s745_s24, 0 }
 0x1d5   :  { %749 = shalt.err (%p1159_p10)  }
 0x1d6   :  { %751 = vsyncmov [#allocation3 + $0xe] }
 0x1d9   :  { %s752_s25 = vpop.sfrf %751 }
 0x1da   :  { %p1160_p11 = scmp.ne.s32.totalorder %s752_s25, 0 }
 0x1dc   :  { %756 = shalt.err (%p1160_p11)  }
 0x1dd   :  { %758 = vsyncmov [#allocation3 + $0xf] }
 0x1e0   :  { %s759_s20 = vpop.sfrf %758 }
 0x1e1   :  { %p1161_p12 = scmp.ne.s32.totalorder %s759_s20, 0 }
 0x1e3   :  { %763 = shalt.err (%p1161_p12)  }
 0x1e4   :  { %765 = vsyncmov [#allocation3 + $0x10] }
 0x1e7   :  { %s766_s28 = vpop.sfrf %765 }
 0x1e8   :  { %p1162_p13 = scmp.ne.s32.totalorder %s766_s28, 0 }
 0x1ea   :  { %770 = shalt.err (%p1162_p13)  }
 0x1eb   :  { %772 = vsyncmov [#allocation3 + $0x11] }
 0x1ee   :  { %s773_s26 = vpop.sfrf %772 }
 0x1ef   :  { %p1163_p0 = scmp.ne.s32.totalorder %s773_s26, 0 }
 0x1f1   :  { %777 = shalt.err (%p1163_p0)  }
 0x1f2   :  { %779 = vsyncmov [#allocation3 + $0x12] }
 0x1f5   :  { %s780_s27 = vpop.sfrf %779 }
 0x1f6   :  { %p1164_p1 = scmp.ne.s32.totalorder %s780_s27, 0 }
 0x1f8   :  { %784 = shalt.err (%p1164_p1)  }
 0x1f9   :  { %786 = vsyncmov [#allocation3 + $0x13] }
 0x1fc   :  { %s787_s30 = vpop.sfrf %786 }
 0x1fd   :  { %p1165_p2 = scmp.ne.s32.totalorder %s787_s30, 0 }
 0x1ff   :  { %791 = shalt.err (%p1165_p2)  }
 0x200   :  { %793 = vsyncmov [#allocation3 + $0x14] }
 0x203   :  { %s794_s4 = vpop.sfrf %793 }
 0x204   :  { %p1166_p3 = scmp.ne.s32.totalorder %s794_s4, 0 }
 0x206   :  { %798 = shalt.err (%p1166_p3)  }
 0x207   :  { %800 = vsyncmov [#allocation3 + $0x15] }
 0x20a   :  { %s801_s6 = vpop.sfrf %800 }
 0x20b   :  { %p1167_p4 = scmp.ne.s32.totalorder %s801_s6, 0 }
 0x20d   :  { %805 = shalt.err (%p1167_p4)  }
 0x20e   :  { %807 = vsyncmov [#allocation3 + $0x16] }
 0x211   :  { %s808_s3 = vpop.sfrf %807 }
 0x212   :  { %p1168_p5 = scmp.ne.s32.totalorder %s808_s3, 0 }
 0x214   :  { %812 = shalt.err (%p1168_p5)  }
 0x215   :  { %814 = vsyncmov [#allocation3 + $0x17] }
 0x218   :  { %s815_s0 = vpop.sfrf %814 }
 0x219   :  { %p1169_p6 = scmp.ne.s32.totalorder %s815_s0, 0 }
 0x21b   :  { %819 = shalt.err (%p1169_p6)  }
 0x21c   :  { %821 = vsyncmov [#allocation3 + $0x18] }
 0x21f   :  { %s822_s1 = vpop.sfrf %821 }
 0x220   :  { %p1170_p7 = scmp.ne.s32.totalorder %s822_s1, 0 }
 0x222   :  { %826 = shalt.err (%p1170_p7)  }
 0x223   :  { %828 = vsyncmov [#allocation3 + $0x19] }
 0x226   :  { %s829_s14 = vpop.sfrf %828 }
 0x227   :  { %p1171_p8 = scmp.ne.s32.totalorder %s829_s14, 0 }
 0x229   :  { %833 = shalt.err (%p1171_p8)  }
 0x22a   :  { %835 = vsyncmov [#allocation3 + $0x1a] }
 0x22d   :  { %s836_s29 = vpop.sfrf %835 }
 0x22e   :  { %p1172_p9 = scmp.ne.s32.totalorder %s836_s29, 0 }
 0x230   :  { %840 = shalt.err (%p1172_p9)  }
 0x231   :  { %842 = vsyncmov [#allocation3 + $0x1b] }
 0x234   :  { %s843_s5 = vpop.sfrf %842 }
 0x235   :  { %p1173_p10 = scmp.ne.s32.totalorder %s843_s5, 0 }
 0x237   :  { %847 = shalt.err (%p1173_p10)  }
 0x238   :  { %849 = vsyncmov [#allocation3 + $0x1c] }
 0x23b   :  { %s850_s7 = vpop.sfrf %849 }
 0x23c   :  { %p1174_p11 = scmp.ne.s32.totalorder %s850_s7, 0 }
 0x23e   :  { %854 = shalt.err (%p1174_p11)  }
 0x23f   :  { %856 = vsyncmov [#allocation3 + $0x1d] }
 0x242   :  { %s857_s8 = vpop.sfrf %856 }
 0x243   :  { %p1175_p12 = scmp.ne.s32.totalorder %s857_s8, 0 }
 0x245   :  { %861 = shalt.err (%p1175_p12)  }
 0x246   :  { %863 = vsyncmov [#allocation3 + $0x1e] }
 0x249   :  { %s864_s9 = vpop.sfrf %863 }
 0x24a   :  { %p1176_p13 = scmp.ne.s32.totalorder %s864_s9, 0 }
 0x24c   :  { %868 = shalt.err (%p1176_p13)  }
 0x24d   :  { %870 = vsyncmov [#allocation3 + $0x1f] }
 0x250   :  { %s871_s13 = vpop.sfrf %870 }
 0x251   :  { %p1177_p0 = scmp.ne.s32.totalorder %s871_s13, 0 }
 0x253   :  { %875 = shalt.err (%p1177_p0)  }

</bundles_post_ra>
